<compile_context>
chip_gen: v5e
topology: v5e:2x2
jax: 0.10.0
libtpu: 0.0.40
codegen_flags: <defaults>
</compile_context>

<pallas_src>
import functools

import jax
import jax.numpy as jnp
from jax.experimental import pallas as pl
from jax.experimental.pallas import tpu as pltpu

EPS = 1e-5


def _write_reflect_pad(pad_ref, v3, h, w, wp):
    """Write the reflect-padded image into the flat (C, Hp*Wp) VMEM buffer.

    v3: (C, H, W) f32 value.  Reflect pad=1 (PyTorch 'reflect'):
      padded col 0 = col 1, padded col Wp-1 = col W-2,
      padded row 0 = row 1, padded row Hp-1 = row H-2.
    """
    c = v3.shape[0]
    # Each interior padded row with its two reflected border columns attached.
    rows = jnp.concatenate([v3[:, :, 1:2], v3, v3[:, :, w - 2:w - 1]], axis=-1)
    rows_flat = rows.reshape(c, h * wp).astype(pad_ref.dtype)     # (C, H*Wp)
    pad_ref[:, pl.ds(wp, h * wp)] = rows_flat                     # rows 1..H
    pad_ref[:, pl.ds(0, wp)] = rows_flat[:, wp:2 * wp]            # row 0   = row 2
    pad_ref[:, pl.ds((h + 1) * wp, wp)] = (                       # row Hp-1 = row Hp-3
        rows_flat[:, (h - 2) * wp:(h - 1) * wp])


def _conv3x3_instancenorm(pad_ref, w_ref, mask, h, w, wp, L):
    """9-tap conv over the flat padded buffer + masked InstanceNorm.

    pad_ref: (C_in, Hp*Wp) reflect-padded activations (compute dtype).
    w_ref:   (9, C_out, C_in) weights (compute dtype).
    mask:    (1, L) f32; 1.0 at valid positions, 0.0 at the 2 seam cols per row.
    Returns (C_out, L) f32 normalized output (seam positions contain junk).
    """
    c_out = w_ref.shape[1]
    acc = jnp.zeros((c_out, L), jnp.float32)
    for k in range(9):                                # static unroll -> 9 MXU calls
        dy, dx = divmod(k, 3)
        slab = pad_ref[:, pl.ds(dy * wp + dx, L)]     # (C_in, L) lane-offset view
        acc = acc + jnp.dot(w_ref[k], slab, preferred_element_type=jnp.float32)
    inv_n = 1.0 / float(h * w)
    mean = jnp.sum(acc * mask, axis=-1, keepdims=True) * inv_n
    diff = acc - mean
    var = jnp.sum(diff * diff * mask, axis=-1, keepdims=True) * inv_n
    return diff * jax.lax.rsqrt(var + EPS)


def _compact(slab, h, w, wp):
    """Drop the seam columns: (C, L) slab layout -> (C, H, W)."""
    c = slab.shape[0]
    full = jnp.concatenate(
        [slab, jnp.zeros((c, wp - w), slab.dtype)], axis=-1)      # (C, H*Wp)
    return full.reshape(c, h, wp)[:, :, :w]


def residual_block_kernel(x_ref, w1_ref, w2_ref, mask_ref, o_ref, pad_ref, *,
                          h, w):
    wp = w + 2
    L = (h - 1) * wp + w
    c = x_ref.shape[1]

    x_flat = x_ref[0].astype(jnp.float32)            # (C, H*W), lane-dense load
    mask = mask_ref[...].astype(jnp.float32)         # (1, L)
    x3 = x_flat.reshape(c, h, w)

    # --- conv1 -> InstanceNorm -> ReLU (intermediate stays in VMEM) ---
    _write_reflect_pad(pad_ref, x3, h, w, wp)
    h1 = jnp.maximum(
        _conv3x3_instancenorm(pad_ref, w1_ref, mask, h, w, wp, L), 0.0)

    # --- conv2 -> InstanceNorm, reflect padding rebuilt in VMEM ---
    _write_reflect_pad(pad_ref, _compact(h1, h, w, wp), h, w, wp)
    h2 = _conv3x3_instancenorm(pad_ref, w2_ref, mask, h, w, wp, L)

    # --- residual add + lane-dense store ---
    out = x_flat + _compact(h2, h, w, wp).reshape(c, h * w)
    o_ref[0] = out.astype(o_ref.dtype)


def residual_block(x, w1, b1, w2, b2, *, use_bf16_matmul=False):
    """x: (N, C, H, W) f32; w1/w2: (C, C, 3, 3); b1/b2: (C,) (ignored: a
    per-channel conv bias is exactly cancelled by affine=False InstanceNorm)."""
    del b1, b2
    n, c, h, w = x.shape
    hp, wp = h + 2, w + 2
    L = (h - 1) * wp + w
    hw = h * w
    cdt = jnp.bfloat16 if use_bf16_matmul else jnp.float32

    # (C_out, C_in, 3, 3) -> (9, C_out, C_in): lane-dense weight layout.
    w1r = jnp.transpose(w1, (2, 3, 0, 1)).reshape(9, c, c).astype(cdt)
    w2r = jnp.transpose(w2, (2, 3, 0, 1)).reshape(9, c, c).astype(cdt)

    # Validity mask for the slab layout (0 on the 2 seam columns per row).
    pos = jnp.arange(L, dtype=jnp.int32)
    mask = ((pos % wp) < w).astype(jnp.float32).reshape(1, L)

    x_flat = x.reshape(n, c, hw)                     # free reshape (contiguous)

    kernel = functools.partial(residual_block_kernel, h=h, w=w)
    out_flat = pl.pallas_call(
        kernel,
        out_shape=jax.ShapeDtypeStruct((n, c, hw), x.dtype),
        grid_spec=pltpu.PrefetchScalarGridSpec(
            num_scalar_prefetch=0,
            grid=(n,),
            in_specs=[
                pl.BlockSpec((1, c, hw), lambda i: (i, 0, 0)),   # x (lane-dense)
                pl.BlockSpec((9, c, c), lambda i: (0, 0, 0)),    # w1 (constant idx)
                pl.BlockSpec((9, c, c), lambda i: (0, 0, 0)),    # w2 (constant idx)
                pl.BlockSpec((1, L), lambda i: (0, 0)),          # seam mask
            ],
            out_specs=pl.BlockSpec((1, c, hw), lambda i: (i, 0, 0)),
            scratch_shapes=[pltpu.VMEM((c, hp * wp), cdt)],      # reflect-pad buf
        ),
        compiler_params=pltpu.CompilerParams(
            dimension_semantics=("parallel",),
            vmem_limit_bytes=32 * 1024 * 1024,
        ),
    )(x_flat, w1r, w2r, mask)
    return out_flat.reshape(n, c, h, w)


def residual_block_ref(x, w1, b1, w2, b2):
    """Pure-JAX reference mirroring the PyTorch module (with biases)."""
    def conv(v, w, b):
        vp = jnp.pad(v, ((0, 0), (0, 0), (1, 1), (1, 1)), mode="reflect")
        y = jax.lax.conv_general_dilated(
            vp, w, window_strides=(1, 1), padding="VALID",
            dimension_numbers=("NCHW", "OIHW", "NCHW"))
        return y + b[None, :, None, None]

    def inorm(y):
        m = jnp.mean(y, axis=(2, 3), keepdims=True)
        v = jnp.mean(jnp.square(y - m), axis=(2, 3), keepdims=True)
        return (y - m) * jax.lax.rsqrt(v + EPS)

    hmid = jnp.maximum(inorm(conv(x, w1, b1)), 0.0)
    return x + inorm(conv(hmid, w2, b2))


if __name__ == "__main__":
    N, C, H, W = 2, 4, 16, 16
    key = jax.random.PRNGKey(0)
    kx, kw1, kb1, kw2, kb2 = jax.random.split(key, 5)

    x = jax.random.normal(kx, (N, C, H, W), jnp.float32)
    w1 = 0.1 * jax.random.normal(kw1, (C, C, 3, 3), jnp.float32)
    b1 = 0.1 * jax.random.normal(kb1, (C,), jnp.float32)
    w2 = 0.1 * jax.random.normal(kw2, (C, C, 3, 3), jnp.float32)
    b2 = 0.1 * jax.random.normal(kb2, (C,), jnp.float32)

    ref = residual_block_ref(x, w1, b1, w2, b2)

    # f32 path: exact PyTorch semantics (also validates bias-cancellation).
    out = jax.block_until_ready(residual_block(x, w1, b1, w2, b2))
    assert out.shape == (N, C, H, W) and out.dtype == x.dtype
    err = float(jnp.max(jnp.abs(out - ref)))
    assert err < 1e-3, err

    # bf16-MXU path (v6e/v7x): f32 accumulation & IN stats, looser tolerance.
    out_bf16 = jax.block_until_ready(
        residual_block(x, w1, b1, w2, b2, use_bf16_matmul=True))
    err_bf16 = float(jnp.max(jnp.abs(out_bf16 - ref)))
    assert err_bf16 < 2e-1, err_bf16

    print("KERNEL_OK")
</pallas_src>

<mosaic_0001>
module attributes {stable_mosaic.version = 11 : i64} {
  func.func @residual_block_kernel(%arg0: i32, %arg1: memref<1x4x256xf32, #tpu.memory_space<vmem>>, %arg2: memref<9x4x4xf32, #tpu.memory_space<vmem>>, %arg3: memref<9x4x4xf32, #tpu.memory_space<vmem>>, %arg4: memref<1x286xf32, #tpu.memory_space<vmem>>, %arg5: memref<1x4x256xf32, #tpu.memory_space<vmem>>, %arg6: memref<4x324xf32, #tpu.memory_space<vmem>>) attributes {dimension_semantics = [#tpu.dimension_semantics<parallel>], iteration_bounds = array<i64: 2>, scalar_prefetch = 0 : i64, scratch_operands = 1 : i64, tpu.core_type = #tpu.core_type<tc>, window_params = [{transform_indices = @transform_0, window_bounds = array<i64: 1, 4, 256>}, {pipeline_mode = #tpu.pipeline_mode<synchronous>, transform_indices = @transform_1, window_bounds = array<i64: 9, 4, 4>}, {pipeline_mode = #tpu.pipeline_mode<synchronous>, transform_indices = @transform_2, window_bounds = array<i64: 9, 4, 4>}, {pipeline_mode = #tpu.pipeline_mode<synchronous>, transform_indices = @transform_3, window_bounds = array<i64: 1, 286>}, {transform_indices = @transform_4, window_bounds = array<i64: 1, 4, 256>}]} {
    %c0 = arith.constant 0 : index
    %c0_0 = arith.constant 0 : index
    %c0_1 = arith.constant 0 : index
    %0 = vector.load %arg1[%c0, %c0_0, %c0_1] : memref<1x4x256xf32, #tpu.memory_space<vmem>>, vector<1x4x256xf32>
    %1 = vector.shape_cast %0 : vector<1x4x256xf32> to vector<4x256xf32>
    %c0_2 = arith.constant 0 : index
    %c0_3 = arith.constant 0 : index
    %2 = vector.load %arg4[%c0_2, %c0_3] : memref<1x286xf32, #tpu.memory_space<vmem>>, vector<1x286xf32>
    %3 = vector.shape_cast %1 : vector<4x256xf32> to vector<4x16x16xf32>
    %4 = vector.extract_strided_slice %3 {offsets = [0, 0, 1], sizes = [4, 16, 1], strides = [1, 1, 1]} : vector<4x16x16xf32> to vector<4x16x1xf32>
    %5 = vector.extract_strided_slice %3 {offsets = [0, 0, 14], sizes = [4, 16, 1], strides = [1, 1, 1]} : vector<4x16x16xf32> to vector<4x16x1xf32>
    %6 = tpu.concatenate %4, %3, %5 in 2 : vector<4x16x1xf32>, vector<4x16x16xf32>, vector<4x16x1xf32> -> vector<4x16x18xf32>
    %7 = vector.shape_cast %6 : vector<4x16x18xf32> to vector<4x288xf32>
    %c0_4 = arith.constant 0 : index
    %c18 = arith.constant 18 : index
    %8 = vector.load %arg6[%c0_4, %c18] : memref<4x324xf32, #tpu.memory_space<vmem>>, vector<4x288xf32>
    tpu.vector_store %arg6[%c0_4, %c18], %7 {strides = array<i32>} : memref<4x324xf32, #tpu.memory_space<vmem>>, vector<4x288xf32>,
    %9 = vector.extract_strided_slice %7 {offsets = [0, 18], sizes = [4, 18], strides = [1, 1]} : vector<4x288xf32> to vector<4x18xf32>
    %c0_5 = arith.constant 0 : index
    %c0_6 = arith.constant 0 : index
    %10 = vector.load %arg6[%c0_5, %c0_6] : memref<4x324xf32, #tpu.memory_space<vmem>>, vector<4x18xf32>
    tpu.vector_store %arg6[%c0_5, %c0_6], %9 {strides = array<i32>} : memref<4x324xf32, #tpu.memory_space<vmem>>, vector<4x18xf32>,
    %11 = vector.extract_strided_slice %7 {offsets = [0, 252], sizes = [4, 18], strides = [1, 1]} : vector<4x288xf32> to vector<4x18xf32>
    %c0_7 = arith.constant 0 : index
    %c306 = arith.constant 306 : index
    %12 = vector.load %arg6[%c0_7, %c306] : memref<4x324xf32, #tpu.memory_space<vmem>>, vector<4x18xf32>
    tpu.vector_store %arg6[%c0_7, %c306], %11 {strides = array<i32>} : memref<4x324xf32, #tpu.memory_space<vmem>>, vector<4x18xf32>,
    %cst = arith.constant 0.000000e+00 : f32
    %13 = vector.broadcast %cst : f32 to vector<4x286xf32>
    %c0_8 = arith.constant 0 : index
    %c0_9 = arith.constant 0 : index
    %14 = vector.load %arg6[%c0_8, %c0_9] : memref<4x324xf32, #tpu.memory_space<vmem>>, vector<4x286xf32>
    %c0_10 = arith.constant 0 : index
    %c0_11 = arith.constant 0 : index
    %c0_12 = arith.constant 0 : index
    %15 = vector.load %arg2[%c0_10, %c0_11, %c0_12] : memref<9x4x4xf32, #tpu.memory_space<vmem>>, vector<1x4x4xf32>
    %16 = vector.shape_cast %15 : vector<1x4x4xf32> to vector<4x4xf32>
    %cst_13 = arith.constant dense<0.000000e+00> : vector<4x286xf32>
    %17 = tpu.matmul %16, %14, %cst_13 {dimension_numbers = #tpu.dot_dimension_numbers<[1], [0], [0], [1], [0, 0, 1, 1], [], []>} : vector<4x4xf32>, vector<4x286xf32>, vector<4x286xf32> -> vector<4x286xf32>
    %18 = arith.addf %13, %17 : vector<4x286xf32>
    %c0_14 = arith.constant 0 : index
    %c1 = arith.constant 1 : index
    %19 = vector.load %arg6[%c0_14, %c1] : memref<4x324xf32, #tpu.memory_space<vmem>>, vector<4x286xf32>
    %c1_15 = arith.constant 1 : index
    %c0_16 = arith.constant 0 : index
    %c0_17 = arith.constant 0 : index
    %20 = vector.load %arg2[%c1_15, %c0_16, %c0_17] : memref<9x4x4xf32, #tpu.memory_space<vmem>>, vector<1x4x4xf32>
    %21 = vector.shape_cast %20 : vector<1x4x4xf32> to vector<4x4xf32>
    %cst_18 = arith.constant dense<0.000000e+00> : vector<4x286xf32>
    %22 = tpu.matmul %21, %19, %cst_18 {dimension_numbers = #tpu.dot_dimension_numbers<[1], [0], [0], [1], [0, 0, 1, 1], [], []>} : vector<4x4xf32>, vector<4x286xf32>, vector<4x286xf32> -> vector<4x286xf32>
    %23 = arith.addf %18, %22 : vector<4x286xf32>
    %c0_19 = arith.constant 0 : index
    %c2 = arith.constant 2 : index
    %24 = vector.load %arg6[%c0_19, %c2] : memref<4x324xf32, #tpu.memory_space<vmem>>, vector<4x286xf32>
    %c2_20 = arith.constant 2 : index
    %c0_21 = arith.constant 0 : index
    %c0_22 = arith.constant 0 : index
    %25 = vector.load %arg2[%c2_20, %c0_21, %c0_22] : memref<9x4x4xf32, #tpu.memory_space<vmem>>, vector<1x4x4xf32>
    %26 = vector.shape_cast %25 : vector<1x4x4xf32> to vector<4x4xf32>
    %cst_23 = arith.constant dense<0.000000e+00> : vector<4x286xf32>
    %27 = tpu.matmul %26, %24, %cst_23 {dimension_numbers = #tpu.dot_dimension_numbers<[1], [0], [0], [1], [0, 0, 1, 1], [], []>} : vector<4x4xf32>, vector<4x286xf32>, vector<4x286xf32> -> vector<4x286xf32>
    %28 = arith.addf %23, %27 : vector<4x286xf32>
    %c0_24 = arith.constant 0 : index
    %c18_25 = arith.constant 18 : index
    %29 = vector.load %arg6[%c0_24, %c18_25] : memref<4x324xf32, #tpu.memory_space<vmem>>, vector<4x286xf32>
    %c3 = arith.constant 3 : index
    %c0_26 = arith.constant 0 : index
    %c0_27 = arith.constant 0 : index
    %30 = vector.load %arg2[%c3, %c0_26, %c0_27] : memref<9x4x4xf32, #tpu.memory_space<vmem>>, vector<1x4x4xf32>
    %31 = vector.shape_cast %30 : vector<1x4x4xf32> to vector<4x4xf32>
    %cst_28 = arith.constant dense<0.000000e+00> : vector<4x286xf32>
    %32 = tpu.matmul %31, %29, %cst_28 {dimension_numbers = #tpu.dot_dimension_numbers<[1], [0], [0], [1], [0, 0, 1, 1], [], []>} : vector<4x4xf32>, vector<4x286xf32>, vector<4x286xf32> -> vector<4x286xf32>
    %33 = arith.addf %28, %32 : vector<4x286xf32>
    %c0_29 = arith.constant 0 : index
    %c19 = arith.constant 19 : index
    %34 = vector.load %arg6[%c0_29, %c19] : memref<4x324xf32, #tpu.memory_space<vmem>>, vector<4x286xf32>
    %c4 = arith.constant 4 : index
    %c0_30 = arith.constant 0 : index
    %c0_31 = arith.constant 0 : index
    %35 = vector.load %arg2[%c4, %c0_30, %c0_31] : memref<9x4x4xf32, #tpu.memory_space<vmem>>, vector<1x4x4xf32>
    %36 = vector.shape_cast %35 : vector<1x4x4xf32> to vector<4x4xf32>
    %cst_32 = arith.constant dense<0.000000e+00> : vector<4x286xf32>
    %37 = tpu.matmul %36, %34, %cst_32 {dimension_numbers = #tpu.dot_dimension_numbers<[1], [0], [0], [1], [0, 0, 1, 1], [], []>} : vector<4x4xf32>, vector<4x286xf32>, vector<4x286xf32> -> vector<4x286xf32>
    %38 = arith.addf %33, %37 : vector<4x286xf32>
    %c0_33 = arith.constant 0 : index
    %c20 = arith.constant 20 : index
    %39 = vector.load %arg6[%c0_33, %c20] : memref<4x324xf32, #tpu.memory_space<vmem>>, vector<4x286xf32>
    %c5 = arith.constant 5 : index
    %c0_34 = arith.constant 0 : index
    %c0_35 = arith.constant 0 : index
    %40 = vector.load %arg2[%c5, %c0_34, %c0_35] : memref<9x4x4xf32, #tpu.memory_space<vmem>>, vector<1x4x4xf32>
    %41 = vector.shape_cast %40 : vector<1x4x4xf32> to vector<4x4xf32>
    %cst_36 = arith.constant dense<0.000000e+00> : vector<4x286xf32>
    %42 = tpu.matmul %41, %39, %cst_36 {dimension_numbers = #tpu.dot_dimension_numbers<[1], [0], [0], [1], [0, 0, 1, 1], [], []>} : vector<4x4xf32>, vector<4x286xf32>, vector<4x286xf32> -> vector<4x286xf32>
    %43 = arith.addf %38, %42 : vector<4x286xf32>
    %c0_37 = arith.constant 0 : index
    %c36 = arith.constant 36 : index
    %44 = vector.load %arg6[%c0_37, %c36] : memref<4x324xf32, #tpu.memory_space<vmem>>, vector<4x286xf32>
    %c6 = arith.constant 6 : index
    %c0_38 = arith.constant 0 : index
    %c0_39 = arith.constant 0 : index
    %45 = vector.load %arg2[%c6, %c0_38, %c0_39] : memref<9x4x4xf32, #tpu.memory_space<vmem>>, vector<1x4x4xf32>
    %46 = vector.shape_cast %45 : vector<1x4x4xf32> to vector<4x4xf32>
    %cst_40 = arith.constant dense<0.000000e+00> : vector<4x286xf32>
    %47 = tpu.matmul %46, %44, %cst_40 {dimension_numbers = #tpu.dot_dimension_numbers<[1], [0], [0], [1], [0, 0, 1, 1], [], []>} : vector<4x4xf32>, vector<4x286xf32>, vector<4x286xf32> -> vector<4x286xf32>
    %48 = arith.addf %43, %47 : vector<4x286xf32>
    %c0_41 = arith.constant 0 : index
    %c37 = arith.constant 37 : index
    %49 = vector.load %arg6[%c0_41, %c37] : memref<4x324xf32, #tpu.memory_space<vmem>>, vector<4x286xf32>
    %c7 = arith.constant 7 : index
    %c0_42 = arith.constant 0 : index
    %c0_43 = arith.constant 0 : index
    %50 = vector.load %arg2[%c7, %c0_42, %c0_43] : memref<9x4x4xf32, #tpu.memory_space<vmem>>, vector<1x4x4xf32>
    %51 = vector.shape_cast %50 : vector<1x4x4xf32> to vector<4x4xf32>
    %cst_44 = arith.constant dense<0.000000e+00> : vector<4x286xf32>
    %52 = tpu.matmul %51, %49, %cst_44 {dimension_numbers = #tpu.dot_dimension_numbers<[1], [0], [0], [1], [0, 0, 1, 1], [], []>} : vector<4x4xf32>, vector<4x286xf32>, vector<4x286xf32> -> vector<4x286xf32>
    %53 = arith.addf %48, %52 : vector<4x286xf32>
    %c0_45 = arith.constant 0 : index
    %c38 = arith.constant 38 : index
    %54 = vector.load %arg6[%c0_45, %c38] : memref<4x324xf32, #tpu.memory_space<vmem>>, vector<4x286xf32>
    %c8 = arith.constant 8 : index
    %c0_46 = arith.constant 0 : index
    %c0_47 = arith.constant 0 : index
    %55 = vector.load %arg2[%c8, %c0_46, %c0_47] : memref<9x4x4xf32, #tpu.memory_space<vmem>>, vector<1x4x4xf32>
    %56 = vector.shape_cast %55 : vector<1x4x4xf32> to vector<4x4xf32>
    %cst_48 = arith.constant dense<0.000000e+00> : vector<4x286xf32>
    %57 = tpu.matmul %56, %54, %cst_48 {dimension_numbers = #tpu.dot_dimension_numbers<[1], [0], [0], [1], [0, 0, 1, 1], [], []>} : vector<4x4xf32>, vector<4x286xf32>, vector<4x286xf32> -> vector<4x286xf32>
    %58 = arith.addf %53, %57 : vector<4x286xf32>
    %59 = vector.broadcast %2 : vector<1x286xf32> to vector<4x286xf32>
    %60 = arith.mulf %58, %59 : vector<4x286xf32>
    %cst_49 = arith.constant dense<0.000000e+00> : vector<4xf32>
    %61 = vector.multi_reduction <add>, %60, %cst_49 [1] : vector<4x286xf32> to vector<4xf32>
    %62 = vector.shape_cast %61 : vector<4xf32> to vector<4x1xf32>
    %cst_50 = arith.constant 3.906250e-03 : f32
    %63 = vector.broadcast %cst_50 : f32 to vector<4x1xf32>
    %64 = arith.mulf %62, %63 : vector<4x1xf32>
    %65 = vector.broadcast %64 : vector<4x1xf32> to vector<4x286xf32>
    %66 = arith.subf %58, %65 : vector<4x286xf32>
    %67 = arith.mulf %66, %66 : vector<4x286xf32>
    %68 = vector.broadcast %2 : vector<1x286xf32> to vector<4x286xf32>
    %69 = arith.mulf %67, %68 : vector<4x286xf32>
    %cst_51 = arith.constant dense<0.000000e+00> : vector<4xf32>
    %70 = vector.multi_reduction <add>, %69, %cst_51 [1] : vector<4x286xf32> to vector<4xf32>
    %71 = vector.shape_cast %70 : vector<4xf32> to vector<4x1xf32>
    %cst_52 = arith.constant 3.906250e-03 : f32
    %72 = vector.broadcast %cst_52 : f32 to vector<4x1xf32>
    %73 = arith.mulf %71, %72 : vector<4x1xf32>
    %cst_53 = arith.constant 9.99999974E-6 : f32
    %74 = vector.broadcast %cst_53 : f32 to vector<4x1xf32>
    %75 = arith.addf %73, %74 : vector<4x1xf32>
    %76 = math.rsqrt %75 : vector<4x1xf32>
    %77 = vector.broadcast %76 : vector<4x1xf32> to vector<4x286xf32>
    %78 = arith.mulf %66, %77 : vector<4x286xf32>
    %cst_54 = arith.constant 0.000000e+00 : f32
    %79 = vector.broadcast %cst_54 : f32 to vector<4x286xf32>
    %80 = arith.maximumf %78, %79 : vector<4x286xf32>
    %cst_55 = arith.constant 0.000000e+00 : f32
    %81 = vector.broadcast %cst_55 : f32 to vector<4x2xf32>
    %82 = tpu.concatenate %80, %81 in 1 : vector<4x286xf32>, vector<4x2xf32> -> vector<4x288xf32>
    %83 = vector.shape_cast %82 : vector<4x288xf32> to vector<4x16x18xf32>
    %84 = vector.extract_strided_slice %83 {offsets = [0, 0, 0], sizes = [4, 16, 16], strides = [1, 1, 1]} : vector<4x16x18xf32> to vector<4x16x16xf32>
    %85 = vector.extract_strided_slice %84 {offsets = [0, 0, 1], sizes = [4, 16, 1], strides = [1, 1, 1]} : vector<4x16x16xf32> to vector<4x16x1xf32>
    %86 = vector.extract_strided_slice %84 {offsets = [0, 0, 14], sizes = [4, 16, 1], strides = [1, 1, 1]} : vector<4x16x16xf32> to vector<4x16x1xf32>
    %87 = tpu.concatenate %85, %84, %86 in 2 : vector<4x16x1xf32>, vector<4x16x16xf32>, vector<4x16x1xf32> -> vector<4x16x18xf32>
    %88 = vector.shape_cast %87 : vector<4x16x18xf32> to vector<4x288xf32>
    %c0_56 = arith.constant 0 : index
    %c18_57 = arith.constant 18 : index
    %89 = vector.load %arg6[%c0_56, %c18_57] : memref<4x324xf32, #tpu.memory_space<vmem>>, vector<4x288xf32>
    tpu.vector_store %arg6[%c0_56, %c18_57], %88 {strides = array<i32>} : memref<4x324xf32, #tpu.memory_space<vmem>>, vector<4x288xf32>,
    %90 = vector.extract_strided_slice %88 {offsets = [0, 18], sizes = [4, 18], strides = [1, 1]} : vector<4x288xf32> to vector<4x18xf32>
    %c0_58 = arith.constant 0 : index
    %c0_59 = arith.constant 0 : index
    %91 = vector.load %arg6[%c0_58, %c0_59] : memref<4x324xf32, #tpu.memory_space<vmem>>, vector<4x18xf32>
    tpu.vector_store %arg6[%c0_58, %c0_59], %90 {strides = array<i32>} : memref<4x324xf32, #tpu.memory_space<vmem>>, vector<4x18xf32>,
    %92 = vector.extract_strided_slice %88 {offsets = [0, 252], sizes = [4, 18], strides = [1, 1]} : vector<4x288xf32> to vector<4x18xf32>
    %c0_60 = arith.constant 0 : index
    %c306_61 = arith.constant 306 : index
    %93 = vector.load %arg6[%c0_60, %c306_61] : memref<4x324xf32, #tpu.memory_space<vmem>>, vector<4x18xf32>
    tpu.vector_store %arg6[%c0_60, %c306_61], %92 {strides = array<i32>} : memref<4x324xf32, #tpu.memory_space<vmem>>, vector<4x18xf32>,
    %cst_62 = arith.constant 0.000000e+00 : f32
    %94 = vector.broadcast %cst_62 : f32 to vector<4x286xf32>
    %c0_63 = arith.constant 0 : index
    %c0_64 = arith.constant 0 : index
    %95 = vector.load %arg6[%c0_63, %c0_64] : memref<4x324xf32, #tpu.memory_space<vmem>>, vector<4x286xf32>
    %c0_65 = arith.constant 0 : index
    %c0_66 = arith.constant 0 : index
    %c0_67 = arith.constant 0 : index
    %96 = vector.load %arg3[%c0_65, %c0_66, %c0_67] : memref<9x4x4xf32, #tpu.memory_space<vmem>>, vector<1x4x4xf32>
    %97 = vector.shape_cast %96 : vector<1x4x4xf32> to vector<4x4xf32>
    %cst_68 = arith.constant dense<0.000000e+00> : vector<4x286xf32>
    %98 = tpu.matmul %97, %95, %cst_68 {dimension_numbers = #tpu.dot_dimension_numbers<[1], [0], [0], [1], [0, 0, 1, 1], [], []>} : vector<4x4xf32>, vector<4x286xf32>, vector<4x286xf32> -> vector<4x286xf32>
    %99 = arith.addf %94, %98 : vector<4x286xf32>
    %c0_69 = arith.constant 0 : index
    %c1_70 = arith.constant 1 : index
    %100 = vector.load %arg6[%c0_69, %c1_70] : memref<4x324xf32, #tpu.memory_space<vmem>>, vector<4x286xf32>
    %c1_71 = arith.constant 1 : index
    %c0_72 = arith.constant 0 : index
    %c0_73 = arith.constant 0 : index
    %101 = vector.load %arg3[%c1_71, %c0_72, %c0_73] : memref<9x4x4xf32, #tpu.memory_space<vmem>>, vector<1x4x4xf32>
    %102 = vector.shape_cast %101 : vector<1x4x4xf32> to vector<4x4xf32>
    %cst_74 = arith.constant dense<0.000000e+00> : vector<4x286xf32>
    %103 = tpu.matmul %102, %100, %cst_74 {dimension_numbers = #tpu.dot_dimension_numbers<[1], [0], [0], [1], [0, 0, 1, 1], [], []>} : vector<4x4xf32>, vector<4x286xf32>, vector<4x286xf32> -> vector<4x286xf32>
    %104 = arith.addf %99, %103 : vector<4x286xf32>
    %c0_75 = arith.constant 0 : index
    %c2_76 = arith.constant 2 : index
    %105 = vector.load %arg6[%c0_75, %c2_76] : memref<4x324xf32, #tpu.memory_space<vmem>>, vector<4x286xf32>
    %c2_77 = arith.constant 2 : index
    %c0_78 = arith.constant 0 : index
    %c0_79 = arith.constant 0 : index
    %106 = vector.load %arg3[%c2_77, %c0_78, %c0_79] : memref<9x4x4xf32, #tpu.memory_space<vmem>>, vector<1x4x4xf32>
    %107 = vector.shape_cast %106 : vector<1x4x4xf32> to vector<4x4xf32>
    %cst_80 = arith.constant dense<0.000000e+00> : vector<4x286xf32>
    %108 = tpu.matmul %107, %105, %cst_80 {dimension_numbers = #tpu.dot_dimension_numbers<[1], [0], [0], [1], [0, 0, 1, 1], [], []>} : vector<4x4xf32>, vector<4x286xf32>, vector<4x286xf32> -> vector<4x286xf32>
    %109 = arith.addf %104, %108 : vector<4x286xf32>
    %c0_81 = arith.constant 0 : index
    %c18_82 = arith.constant 18 : index
    %110 = vector.load %arg6[%c0_81, %c18_82] : memref<4x324xf32, #tpu.memory_space<vmem>>, vector<4x286xf32>
    %c3_83 = arith.constant 3 : index
    %c0_84 = arith.constant 0 : index
    %c0_85 = arith.constant 0 : index
    %111 = vector.load %arg3[%c3_83, %c0_84, %c0_85] : memref<9x4x4xf32, #tpu.memory_space<vmem>>, vector<1x4x4xf32>
    %112 = vector.shape_cast %111 : vector<1x4x4xf32> to vector<4x4xf32>
    %cst_86 = arith.constant dense<0.000000e+00> : vector<4x286xf32>
    %113 = tpu.matmul %112, %110, %cst_86 {dimension_numbers = #tpu.dot_dimension_numbers<[1], [0], [0], [1], [0, 0, 1, 1], [], []>} : vector<4x4xf32>, vector<4x286xf32>, vector<4x286xf32> -> vector<4x286xf32>
    %114 = arith.addf %109, %113 : vector<4x286xf32>
    %c0_87 = arith.constant 0 : index
    %c19_88 = arith.constant 19 : index
    %115 = vector.load %arg6[%c0_87, %c19_88] : memref<4x324xf32, #tpu.memory_space<vmem>>, vector<4x286xf32>
    %c4_89 = arith.constant 4 : index
    %c0_90 = arith.constant 0 : index
    %c0_91 = arith.constant 0 : index
    %116 = vector.load %arg3[%c4_89, %c0_90, %c0_91] : memref<9x4x4xf32, #tpu.memory_space<vmem>>, vector<1x4x4xf32>
    %117 = vector.shape_cast %116 : vector<1x4x4xf32> to vector<4x4xf32>
    %cst_92 = arith.constant dense<0.000000e+00> : vector<4x286xf32>
    %118 = tpu.matmul %117, %115, %cst_92 {dimension_numbers = #tpu.dot_dimension_numbers<[1], [0], [0], [1], [0, 0, 1, 1], [], []>} : vector<4x4xf32>, vector<4x286xf32>, vector<4x286xf32> -> vector<4x286xf32>
    %119 = arith.addf %114, %118 : vector<4x286xf32>
    %c0_93 = arith.constant 0 : index
    %c20_94 = arith.constant 20 : index
    %120 = vector.load %arg6[%c0_93, %c20_94] : memref<4x324xf32, #tpu.memory_space<vmem>>, vector<4x286xf32>
    %c5_95 = arith.constant 5 : index
    %c0_96 = arith.constant 0 : index
    %c0_97 = arith.constant 0 : index
    %121 = vector.load %arg3[%c5_95, %c0_96, %c0_97] : memref<9x4x4xf32, #tpu.memory_space<vmem>>, vector<1x4x4xf32>
    %122 = vector.shape_cast %121 : vector<1x4x4xf32> to vector<4x4xf32>
    %cst_98 = arith.constant dense<0.000000e+00> : vector<4x286xf32>
    %123 = tpu.matmul %122, %120, %cst_98 {dimension_numbers = #tpu.dot_dimension_numbers<[1], [0], [0], [1], [0, 0, 1, 1], [], []>} : vector<4x4xf32>, vector<4x286xf32>, vector<4x286xf32> -> vector<4x286xf32>
    %124 = arith.addf %119, %123 : vector<4x286xf32>
    %c0_99 = arith.constant 0 : index
    %c36_100 = arith.constant 36 : index
    %125 = vector.load %arg6[%c0_99, %c36_100] : memref<4x324xf32, #tpu.memory_space<vmem>>, vector<4x286xf32>
    %c6_101 = arith.constant 6 : index
    %c0_102 = arith.constant 0 : index
    %c0_103 = arith.constant 0 : index
    %126 = vector.load %arg3[%c6_101, %c0_102, %c0_103] : memref<9x4x4xf32, #tpu.memory_space<vmem>>, vector<1x4x4xf32>
    %127 = vector.shape_cast %126 : vector<1x4x4xf32> to vector<4x4xf32>
    %cst_104 = arith.constant dense<0.000000e+00> : vector<4x286xf32>
    %128 = tpu.matmul %127, %125, %cst_104 {dimension_numbers = #tpu.dot_dimension_numbers<[1], [0], [0], [1], [0, 0, 1, 1], [], []>} : vector<4x4xf32>, vector<4x286xf32>, vector<4x286xf32> -> vector<4x286xf32>
    %129 = arith.addf %124, %128 : vector<4x286xf32>
    %c0_105 = arith.constant 0 : index
    %c37_106 = arith.constant 37 : index
    %130 = vector.load %arg6[%c0_105, %c37_106] : memref<4x324xf32, #tpu.memory_space<vmem>>, vector<4x286xf32>
    %c7_107 = arith.constant 7 : index
    %c0_108 = arith.constant 0 : index
    %c0_109 = arith.constant 0 : index
    %131 = vector.load %arg3[%c7_107, %c0_108, %c0_109] : memref<9x4x4xf32, #tpu.memory_space<vmem>>, vector<1x4x4xf32>
    %132 = vector.shape_cast %131 : vector<1x4x4xf32> to vector<4x4xf32>
    %cst_110 = arith.constant dense<0.000000e+00> : vector<4x286xf32>
    %133 = tpu.matmul %132, %130, %cst_110 {dimension_numbers = #tpu.dot_dimension_numbers<[1], [0], [0], [1], [0, 0, 1, 1], [], []>} : vector<4x4xf32>, vector<4x286xf32>, vector<4x286xf32> -> vector<4x286xf32>
    %134 = arith.addf %129, %133 : vector<4x286xf32>
    %c0_111 = arith.constant 0 : index
    %c38_112 = arith.constant 38 : index
    %135 = vector.load %arg6[%c0_111, %c38_112] : memref<4x324xf32, #tpu.memory_space<vmem>>, vector<4x286xf32>
    %c8_113 = arith.constant 8 : index
    %c0_114 = arith.constant 0 : index
    %c0_115 = arith.constant 0 : index
    %136 = vector.load %arg3[%c8_113, %c0_114, %c0_115] : memref<9x4x4xf32, #tpu.memory_space<vmem>>, vector<1x4x4xf32>
    %137 = vector.shape_cast %136 : vector<1x4x4xf32> to vector<4x4xf32>
    %cst_116 = arith.constant dense<0.000000e+00> : vector<4x286xf32>
    %138 = tpu.matmul %137, %135, %cst_116 {dimension_numbers = #tpu.dot_dimension_numbers<[1], [0], [0], [1], [0, 0, 1, 1], [], []>} : vector<4x4xf32>, vector<4x286xf32>, vector<4x286xf32> -> vector<4x286xf32>
    %139 = arith.addf %134, %138 : vector<4x286xf32>
    %140 = vector.broadcast %2 : vector<1x286xf32> to vector<4x286xf32>
    %141 = arith.mulf %139, %140 : vector<4x286xf32>
    %cst_117 = arith.constant dense<0.000000e+00> : vector<4xf32>
    %142 = vector.multi_reduction <add>, %141, %cst_117 [1] : vector<4x286xf32> to vector<4xf32>
    %143 = vector.shape_cast %142 : vector<4xf32> to vector<4x1xf32>
    %cst_118 = arith.constant 3.906250e-03 : f32
    %144 = vector.broadcast %cst_118 : f32 to vector<4x1xf32>
    %145 = arith.mulf %143, %144 : vector<4x1xf32>
    %146 = vector.broadcast %145 : vector<4x1xf32> to vector<4x286xf32>
    %147 = arith.subf %139, %146 : vector<4x286xf32>
    %148 = arith.mulf %147, %147 : vector<4x286xf32>
    %149 = vector.broadcast %2 : vector<1x286xf32> to vector<4x286xf32>
    %150 = arith.mulf %148, %149 : vector<4x286xf32>
    %cst_119 = arith.constant dense<0.000000e+00> : vector<4xf32>
    %151 = vector.multi_reduction <add>, %150, %cst_119 [1] : vector<4x286xf32> to vector<4xf32>
    %152 = vector.shape_cast %151 : vector<4xf32> to vector<4x1xf32>
    %cst_120 = arith.constant 3.906250e-03 : f32
    %153 = vector.broadcast %cst_120 : f32 to vector<4x1xf32>
    %154 = arith.mulf %152, %153 : vector<4x1xf32>
    %cst_121 = arith.constant 9.99999974E-6 : f32
    %155 = vector.broadcast %cst_121 : f32 to vector<4x1xf32>
    %156 = arith.addf %154, %155 : vector<4x1xf32>
    %157 = math.rsqrt %156 : vector<4x1xf32>
    %158 = vector.broadcast %157 : vector<4x1xf32> to vector<4x286xf32>
    %159 = arith.mulf %147, %158 : vector<4x286xf32>
    %cst_122 = arith.constant 0.000000e+00 : f32
    %160 = vector.broadcast %cst_122 : f32 to vector<4x2xf32>
    %161 = tpu.concatenate %159, %160 in 1 : vector<4x286xf32>, vector<4x2xf32> -> vector<4x288xf32>
    %162 = vector.shape_cast %161 : vector<4x288xf32> to vector<4x16x18xf32>
    %163 = vector.extract_strided_slice %162 {offsets = [0, 0, 0], sizes = [4, 16, 16], strides = [1, 1, 1]} : vector<4x16x18xf32> to vector<4x16x16xf32>
    %164 = vector.shape_cast %163 : vector<4x16x16xf32> to vector<4x256xf32>
    %165 = arith.addf %1, %164 : vector<4x256xf32>
    %c0_123 = arith.constant 0 : index
    %c0_124 = arith.constant 0 : index
    %c0_125 = arith.constant 0 : index
    %166 = vector.load %arg5[%c0_123, %c0_124, %c0_125] : memref<1x4x256xf32, #tpu.memory_space<vmem>>, vector<1x4x256xf32>
    %167 = vector.shape_cast %166 : vector<1x4x256xf32> to vector<4x256xf32>
    %168 = vector.shape_cast %165 : vector<4x256xf32> to vector<1x4x256xf32>
    tpu.vector_store %arg5[%c0_123, %c0_124, %c0_125], %168 {strides = array<i32>} : memref<1x4x256xf32, #tpu.memory_space<vmem>>, vector<1x4x256xf32>,
    return
  }
  func.func @transform_0(%arg0: i32) -> (i32, i32, i32) {
    %c0_i32 = arith.constant 0 : i32
    %c0_i32_0 = arith.constant 0 : i32
    %c0_i32_1 = arith.constant 0 : i32
    return %arg0, %c0_i32, %c0_i32_0 : i32, i32, i32
  }
  func.func @transform_1(%arg0: i32) -> (i32, i32, i32) {
    %c0_i32 = arith.constant 0 : i32
    %c0_i32_0 = arith.constant 0 : i32
    %c0_i32_1 = arith.constant 0 : i32
    %c0_i32_2 = arith.constant 0 : i32
    return %c0_i32, %c0_i32_0, %c0_i32_1 : i32, i32, i32
  }
  func.func @transform_2(%arg0: i32) -> (i32, i32, i32) {
    %c0_i32 = arith.constant 0 : i32
    %c0_i32_0 = arith.constant 0 : i32
    %c0_i32_1 = arith.constant 0 : i32
    %c0_i32_2 = arith.constant 0 : i32
    return %c0_i32, %c0_i32_0, %c0_i32_1 : i32, i32, i32
  }
  func.func @transform_3(%arg0: i32) -> (i32, i32) {
    %c0_i32 = arith.constant 0 : i32
    %c0_i32_0 = arith.constant 0 : i32
    %c0_i32_1 = arith.constant 0 : i32
    return %c0_i32, %c0_i32_0 : i32, i32
  }
  func.func @transform_4(%arg0: i32) -> (i32, i32, i32) {
    %c0_i32 = arith.constant 0 : i32
    %c0_i32_0 = arith.constant 0 : i32
    %c0_i32_1 = arith.constant 0 : i32
    return %arg0, %c0_i32, %c0_i32_0 : i32, i32, i32
  }
}

</mosaic_0001>

<bundles_post_ra>
// kernel: tpu_custom_call.1
= control target key start
LH: loop header
LB: loop body
LE: loop exit
PB: predicated region body
PF: predicated region fallthrough
CT: control target
= control target key end

     0   :  { %9 = vsyncpa [#allocation4], 0  ;;  %s4772_s0 = inlined_call_operand.vmem [shape: f32[2,4,256], index: 0, kind: input, shape index: {}]   ;;  %s4773_s1 = inlined_call_operand.vmem [shape: f32[9,4,4], index: 1, kind: input, shape index: {}]   ;;  %s4774_s2 = inlined_call_operand.vmem [shape: f32[9,4,4], index: 2, kind: input, shape index: {}]   ;;  %s4775_s3 = inlined_call_operand.vmem [shape: f32[1,286], index: 3, kind: input, shape index: {}]   ;;  %s4776_s4 = inlined_call_operand.hbm [shape: f32[2,4,256], index: 4, kind: output, shape index: {}]  }
   0x1   :  { %11 = vsyncpa [#allocation4 + $0x1], 0  ;;  %s3780_s15 = smov 0   ;;  %s3782_s16 = smov 0  }
   0x2   :  { %s3784_s17 = smov 0   ;;  %s3786_s18 = smov 0  }
   0x3 LB: > { %s3801_s19 = sadd.s32 4294967295, %s3711_s18   ;;  %s3421_s20 = sadd.s32 4294967294, %s3711_s18   ;;  %s3711_s18 = sphi %s3786_s18, %s4902_s18   ;;  %s3707_s17 = sphi %s3784_s17, %s4901_s17   ;;  %s3703_s16 = sphi %s3782_s16, %s4900_s16   ;;  %s3699_s15 = sphi %s3780_s15, %s4899_s15  }
   0x4   : > { %s3805_s21 = sadd.s32 1, %s3711_s18   ;;  %s113_s22 = sadd.s32 1, %s3707_s17 }
   0x5   : > { %s110_s23 = ssub.s32 %s3711_s18, %s3805_s21  ;;  %p123_p0 = scmp.ne.s32.totalorder %s3707_s17, %s3703_s16 }
   0x6   : > { %p111_p1 = scmp.eq.s32.totalorder %s110_s23, 0  ;;  %p124_p2 = scmp.eq.s32.totalorder %s3801_s19, 1 }
   0x7   : > { %p129_p3 = scmp.ne.s32.totalorder %s3703_s16, %s3699_s15  ;;  %p130_p4 = scmp.eq.s32.totalorder %s3421_s20, 1 }
   0x8   : > { %s3816_s24 = scalar_select %p111_p1, %s3707_s17, %s113_s22  }
   0x9   : > { %p3818_p5 = por %p124_p2, %p123_p0  ;;  %p3822_p6 = por %p130_p4, %p129_p3 }
   0xa   : > { %p3424_p7 = scmp.ge.s32.totalorder %s3711_s18, 1  ;;  %p165_p8 = scmp.lt.s32.totalorder %s3711_s18, 3 }
   0xc   : > { %p166_p9 = pnand %p3424_p7, %p165_p8 }
   0xd   : > { %p191_p10 = scmp.lt.s32.totalorder (!%p166_p9), %s3801_s19, 1  ;;  %s4779_s6 = smov (!%p166_p9), 80  }
   0xe   : > { %169 = sbr.rel (%p166_p9) target bundleno = 2853 (0xb25), region = 36  ;;  %s4833_s7 = smov (!%p166_p9), 112  }
   0xf   : > { %s4783_s8 = smov (!%p166_p9), 64   ;;  %s4823_s9 = smov (!%p166_p9), 16  }
  0x10   : > { %s4777_s10 = smov (!%p166_p9), 48   ;;  %s4781_s11 = smov (!%p166_p9), 96  }
  0x11   : > { %s4785_s12 = smov (!%p166_p9), 32   ;;  %s3722_s13 = smov (!%p166_p9), 127  }
  0x12   : > { %s3723_s14 = smov (!%p166_p9), 1   ;;  %s3724_s20 = smov (!%p166_p9), 3  }
  0x13   : > { %s192_s27 = scalar_select %p191_p10, %s3801_s19, 1  ;;  %v3720_v3 = vmov 1983009808   ;;  %vm237_vm0 = vcmask 1047556   ;;  %v3721_v12 = vmov 1934713408  }
  0x14   : > { %v240_v4 = vunpack.c.l.s4 %v3720_v3  ;;  %v254_v13 = vunpack.c.l.s4 %v3721_v12  ;;  %vm530_vm1 = vcmask 7168   ;;  %vm539_vm2 = vcmask 138240   ;;  %s3725_s22 = smov 72   ;;  %s3726_s23 = smov 36  }
  0x15   : > { %s3561_s28 = sshll.u32 %s192_s27, 3  ;;  %s4808_s27 = smov 126   ;;  %vm720_vm3 = vcmask 146432   ;;  %vm4791_vm4 = vcmask 293888   ;;  %vm724_vm5 = vcmask 441344   ;;  %vm4790_vm6 = vcmask 588800  }
  0x16   : > { %s3833_s5 = scalar_lea.vmem %s4772_s0, %s3561_s28  ;;  %v3843_v11 = vunpack.c.0.s8 %v240_v4  ;;  %v3853_v24 = vunpack.c.0.s8 %v254_v13  ;;  %s4789_s28 = smov 88   ;;  %vm4837_vm7 = vcmask 130048   ;;  %vm736_vm8 = vcmask 277504  }
  0x17   : > { %v196_v0 = vld [vmem:[%s3833_s5] sm:$0xff]  ;;  %s4788_s29 = smov 52   ;;  %s4787_s30 = smov 70   ;;  %vm4792_vm9 = vcmask 424960   ;;  %vm728_vm10 = vcmask 736256   ;;  %vm740_vm11 = vcmask 572416  }
  0x18   : > { %209 = vrot.lane.b32.xlu1 %v196_v0, %s4779_s6  ;;  %201 = vrot.lane.b32.xlu0 %v196_v0, %s4833_s7  ;;  %v199_v5 = vrot.slane %v196_v0, 4  ;;  %s3732_s6 = smov 18   ;;  %vm4796_vm12 = vcmask 719872   ;;  %vm4795_vm13 = vcmask 867328   ;;  %vm4818_vm14 = vcmask 883712  }
  0x19   : > { %213 = vrot.lane.b32.xlu2 %v196_v0, %s4783_s8  ;;  %s4807_s8 = smov 34   ;;  %vm4794_vm15 = vcmask 1014784  }
  0x20   : > { %225 = vrot.lane.b32.xlu1 %v196_v0, %s4823_s9  ;;  %217 = vrot.lane.b32.xlu0 %v196_v0, %s4777_s10  ;;  %s4821_s10 = smov 90  }
  0x21   : > { %205 = vrot.lane.b32.xlu2 %v196_v0, %s4781_s11  ;;  %s4804_s11 = smov 54  }
  0x28   : > { %221 = vrot.lane.b32.xlu0 %v196_v0, %s4785_s12  ;;  %s4799_s12 = smov 124  }
  0x73   : > { %v214_v1 = vpop.permute.xlu2 %213 }
  0x74   : > { %v215_v40 = vrot.slane %v214_v1, 4 }
  0x7b   : > { %v206_v2 = vpop.permute.xlu2 %205 }
  0x7c   : > { %v236_v6 = vrot.slane %v206_v2, 4  ;;  %v294_v15 = vsel %vm237_vm0, %v206_v2, %v199_v5 }
  0x7d   : > { %v298_v21 = vperm.slane %v294_v15, %v3843_v11 }
  0x7e   : > { %v238_v14 = vsel %vm237_vm0, %v236_v6, %v196_v0 }
  0x7f   : > { %v242_v20 = vperm.slane %v238_v14, %v3843_v11  ;;  %v307_v54 = vrot.slane %v298_v21, 4 }
  0x81   : > { %v251_v52 = vrot.slane %v242_v20, 4 }
  0x8a   : > { %v210_v7 = vpop.permute.xlu1 %209  ;;  %v202_v8 = vpop.permute.xlu0 %201 }
  0x8b   : > { %v243_v9 = vrot.slane %v210_v7, 4  ;;  %v203_v10 = vrot.slane %v202_v8, 4 }
  0x8d   : > { %v244_v16 = vsel %vm237_vm0, %v243_v9, %v202_v8  ;;  %v300_v17 = vsel %vm237_vm0, %v210_v7, %v203_v10 }
  0x8e   : > { %v248_v18 = vperm.slane %v244_v16, %v3843_v11  ;;  %v304_v19 = vperm.slane %v300_v17, %v3843_v11 }
  0x90   : > { %v249_v22 = vrot.slane %v248_v18, 4  ;;  %v305_v23 = vrot.slane %v304_v19, 4  ;;  %v252_v61 = vsel %vm237_vm0, %v248_v18, %v251_v52  ;;  %v308_v0 = vsel %vm237_vm0, %v304_v19, %v307_v54 }
  0x91   : > { %v3913_v4 = vperm.slane %v252_v61, %v3853_v24  ;;  %v3917_v5 = vperm.slane %v308_v0, %v3853_v24 }
  0x92   : > { %v250_v25 = vsel %vm237_vm0, %v249_v22, %v242_v20  ;;  %v306_v26 = vsel %vm237_vm0, %v305_v23, %v298_v21  ;;  %v226_v27 = vpop.permute.xlu1 %225  ;;  %v218_v28 = vpop.permute.xlu0 %217 }
  0x93   : > { %v3858_v29 = vperm.slane %v250_v25, %v3853_v24  ;;  %v3861_v30 = vperm.slane %v306_v26, %v3853_v24  ;;  %v271_v31 = vrot.slane %v226_v27, 4  ;;  %v219_v32 = vrot.slane %v218_v28, 4 }
  0x94   : > { %v263_v9 = vrot.slane %v3913_v4, 4  ;;  %v319_v12 = vrot.slane %v3917_v5, 4 }
  0x95   : > { %v261_v33 = vrot.slane %v3858_v29, 4  ;;  %v317_v34 = vrot.slane %v3861_v30, 4  ;;  %365 = vst [vmem:[#allocation1] ss:$2 sm:$0xff] %v3858_v29  ;;  %v328_v35 = vsel %vm237_vm0, %v226_v27, %v219_v32  ;;  %v272_v38 = vsel %vm237_vm0, %v271_v31, %v218_v28 }
  0x96   : > { %369 = vst [vmem:[#allocation1 + $0x10] ss:$2 sm:$0xff] %v3861_v30  ;;  %v332_v39 = vperm.slane %v328_v35, %v3843_v11  ;;  %v276_v41 = vperm.slane %v272_v38, %v3843_v11  ;;  %v264_v17 = vsel %vm237_vm0, 0.0, %v263_v9  ;;  %v3941_v18 = vsel %vm237_vm0, 0.0, %v319_v12 }
  0x97   : > { %v3869_v36 = vsel %vm237_vm0, 0.0, %v261_v33  ;;  %v3872_v37 = vsel %vm237_vm0, 0.0, %v317_v34 }
  0x98   : > { %375 = vst [vmem:[#allocation1 + $0x20] ss:$2 sm:$0xff] %v3869_v36  ;;  %v333_v45 = vrot.slane %v332_v39, 4  ;;  %v277_v48 = vrot.slane %v276_v41, 4 }
  0x99   : > { %379 = vst [vmem:[#allocation1 + $0x30] ss:$2 sm:$0xff] %v3872_v37 }
  0x9a   : > { %v222_v42 = vpop.permute.xlu0 %221 }
  0x9b   : > { %v265_v43 = vrot.slane %v222_v42, 4  ;;  %v322_v44 = vsel %vm237_vm0, %v222_v42, %v215_v40 }
  0x9c   : > { %v326_v46 = vperm.slane %v322_v44, %v3843_v11 }
  0x9d   : > { %v266_v47 = vsel %vm237_vm0, %v265_v43, %v214_v1 }
  0x9e   : > { %v270_v49 = vperm.slane %v266_v47, %v3843_v11  ;;  %v334_v50 = vsel %vm237_vm0, %v333_v45, %v326_v46  ;;  %v335_v51 = vrot.slane %v326_v46, 4 }
  0x9f   : > { %v3885_v53 = vperm.slane %v334_v50, %v3853_v24 }
  0xa0   : > { %v278_v55 = vsel %vm237_vm0, %v277_v48, %v270_v49  ;;  %v279_v56 = vrot.slane %v270_v49, 4  ;;  %v336_v58 = vsel %vm237_vm0, %v332_v39, %v335_v51 }
  0xa1   : > { %v3889_v57 = vperm.slane %v278_v55, %v3853_v24  ;;  %v345_v59 = vrot.slane %v3885_v53, 4  ;;  %371 = vst [vmem:[#allocation1 + $0x11] ss:$2 sm:$0xff] %v3885_v53  ;;  %v3903_v1 = vperm.slane %v336_v58, %v3853_v24 }
  0xa2   : > { %v280_v60 = vsel %vm237_vm0, %v276_v41, %v279_v56 }
  0xa3   : > { %v289_v62 = vrot.slane %v3889_v57, 4  ;;  %v3898_v63 = vsel %vm237_vm0, 0.0, %v345_v59  ;;  %367 = vst [vmem:[#allocation1 + $0x1] ss:$2 sm:$0xff] %v3889_v57  ;;  %v3907_v2 = vperm.slane %v280_v60, %v3853_v24  ;;  %v347_v6 = vrot.slane %v3903_v1, 4 }
  0xa4   : > { %381 = vst [vmem:[#allocation1 + $0x31] ss:$2 sm:$0xff] %v3898_v63 }
  0xa5   : > { %v3910_v3 = vsel %vm237_vm0, 0.0, %v289_v62  ;;  %v291_v8 = vrot.slane %v3907_v2, 4  ;;  %v3930_v14 = vsel %vm237_vm0, 0.0, %v347_v6 }
  0xa6   : > { %377 = vst [vmem:[#allocation1 + $0x21] ss:$2 sm:$0xff] %v3910_v3 }
  0xa7   : > { %v3934_v15 = vsel %vm237_vm0, 0.0, %v291_v8 }
  0xa8   : > { %v3920_v7 = vld.sshfl [vmem:[#allocation1 + $0x10] sm:$0xff pattern:$0x75316420] }
  0xa9   : > { %386 = vst [vmem:[#allocation1 + $0x10] ss:$2 sm:$0xff] %v3917_v5 }
  0xaa   : > { %v372_v10 = vld.sshfl [vmem:[#allocation1] sm:$0xff pattern:$0x75316420]  ;;  %387 = vst [vmem:[#allocation1 + $0x11] ss:$2 sm:$0xff] %v3903_v1 }
  0xab   : > { %v383_v13 = vld.sshfl [vmem:[#allocation1 + $0x30] sm:$0xff pattern:$0x75316420]  ;;  %384 = vst [vmem:[#allocation1] ss:$2 sm:$0xff] %v3913_v4  ;;  %396 = vrot.lane.b32.xlu1 %v372_v10, %s3722_s13 }
  0xac   : > { %385 = vst [vmem:[#allocation1 + $0x1] ss:$2 sm:$0xff] %v3907_v2 }
  0xad   : > { %v382_v16 = vld.sshfl [vmem:[#allocation1 + $0x20] sm:$0xff pattern:$0x75316420]  ;;  %393 = vst [vmem:[#allocation1 + $0x31] ss:$2 sm:$0xff] %v3930_v14 }
  0xae   : > { %391 = vst [vmem:[#allocation1 + $0x21] ss:$2 sm:$0xff] %v3934_v15  ;;  %400 = vrot.lane.b32.xlu0 %v382_v16, %s3722_s13 }
  0xaf   : > { %390 = vst [vmem:[#allocation1 + $0x20] ss:$2 sm:$0xff] %v264_v17 }
  0xb0   : > { %392 = vst [vmem:[#allocation1 + $0x30] ss:$2 sm:$0xff] %v3941_v18 }
  0xb1   : > { %v389_v19 = vld.sshfl [vmem:[#allocation1 + $0x10] sm:$0xff pattern:$0x75316420] }
  0xb2   : > { %424 = vst [vmem:[#allocation1 + $0x10] ss:$2 sm:$0xff] %v3861_v30  ;;  %406 = vrot.lane.b32.xlu2 %v389_v19, %s3722_s13 }
  0xb3   : > { %v388_v20 = vld.sshfl [vmem:[#allocation1] sm:$0xff pattern:$0x75316420]  ;;  %426 = vst [vmem:[#allocation1 + $0x11] ss:$2 sm:$0xff] %v3885_v53  ;;  %402 = vrot.lane.b32.xlu1 %v383_v13, %s3722_s13 }
  0xb4   : > { %420 = vst [vmem:[#allocation1] ss:$2 sm:$0xff] %v3858_v29 }
  0xb5   : > { %422 = vst [vmem:[#allocation1 + $0x1] ss:$2 sm:$0xff] %v3889_v57 }
  0xb6   : > { %v394_v21 = vld.sshfl [vmem:[#allocation1 + $0x20] sm:$0xff pattern:$0x75316420] }
  0xb7   : > { %v395_v22 = vld.sshfl [vmem:[#allocation1 + $0x30] sm:$0xff pattern:$0x75316420]  ;;  %430 = vst [vmem:[#allocation1 + $0x20] ss:$2 sm:$0xff] %v3869_v36 }
  0xb8   : > { %410 = vrot.lane.b32.xlu0 %v395_v22, %s3722_s13  ;;  %434 = vst [vmem:[#allocation1 + $0x30] ss:$2 sm:$0xff] %v3872_v37 }
  0xb9   : > { %436 = vst [vmem:[#allocation1 + $0x31] ss:$2 sm:$0xff] %v3898_v63 }
  0xba   : > { %v428_v23 = vld.sshfl [vmem:[#allocation1 + $0x10] sm:$0xff pattern:$0x75316420]  ;;  %432 = vst [vmem:[#allocation1 + $0x21] ss:$2 sm:$0xff] %v3910_v3  ;;  %408 = vrot.lane.b32.xlu2 %v394_v21, %s3722_s13 }
  0xbb   : > { %441 = vst [vmem:[#allocation1 + $0x10] ss:$2 sm:$0xff] %v3917_v5  ;;  %404 = vrot.lane.b32.xlu1 %v388_v20, %s3722_s13 }
  0xbc   : > { %v427_v25 = vld.sshfl [vmem:[#allocation1] sm:$0xff pattern:$0x75316420]  ;;  %442 = vst [vmem:[#allocation1 + $0x11] ss:$2 sm:$0xff] %v3903_v1 }
  0xbd   : > { %439 = vst [vmem:[#allocation1] ss:$2 sm:$0xff] %v3913_v4 }
  0xbe   : > { %440 = vst [vmem:[#allocation1 + $0x1] ss:$2 sm:$0xff] %v3907_v2 }
  0xc0   : > { %v438_v26 = vld.sshfl [vmem:[#allocation1 + $0x30] sm:$0xff pattern:$0x75316420] }
  0xc1   : > { %v437_v27 = vld.sshfl [vmem:[#allocation1 + $0x20] sm:$0xff pattern:$0x75316420]  ;;  %447 = vst [vmem:[#allocation1 + $0x30] ss:$2 sm:$0xff] %v3941_v18 }
  0xc2   : > { %455 = vrot.lane.b32.xlu0 %v437_v27, %s3723_s14  ;;  %445 = vst [vmem:[#allocation1 + $0x20] ss:$2 sm:$0xff] %v264_v17  ;;  %451 = vrot.lane.b32.xlu2 %v427_v25, %s3723_s14 }
  0xc3   : > { %v444_v28 = vld.sshfl [vmem:[#allocation1 + $0x10] sm:$0xff pattern:$0x75316420]  ;;  %446 = vst [vmem:[#allocation1 + $0x21] ss:$2 sm:$0xff] %v3934_v15 }
  0xc4   : > { %479 = vst [vmem:[#allocation1 + $0x10] ss:$2 sm:$0xff] %v3861_v30 }
  0xc5   : > { %v443_v31 = vld.sshfl [vmem:[#allocation1] sm:$0xff pattern:$0x75316420]  ;;  %481 = vst [vmem:[#allocation1 + $0x11] ss:$2 sm:$0xff] %v3885_v53 }
  0xc6   : > { %475 = vst [vmem:[#allocation1] ss:$2 sm:$0xff] %v3858_v29  ;;  %459 = vrot.lane.b32.xlu1 %v443_v31, %s3723_s14 }
  0xc7   : > { %477 = vst [vmem:[#allocation1 + $0x1] ss:$2 sm:$0xff] %v3889_v57 }
  0xc8   : > { %448 = vst [vmem:[#allocation1 + $0x31] ss:$2 sm:$0xff] %v3930_v14 }
  0xca   : > { %457 = vrot.lane.b32.xlu0 %v438_v26, %s3723_s14  ;;  %v449_v32 = vld.sshfl [vmem:[#allocation1 + $0x20] sm:$0xff pattern:$0x75316420] }
  0xcb   : > { %485 = vst [vmem:[#allocation1 + $0x20] ss:$2 sm:$0xff] %v3869_v36  ;;  %463 = vrot.lane.b32.xlu2 %v449_v32, %s3723_s14 }
  0xcc   : > { %v483_v33 = vld.sshfl [vmem:[#allocation1 + $0x10] sm:$0xff pattern:$0x75316420]  ;;  %487 = vst [vmem:[#allocation1 + $0x21] ss:$2 sm:$0xff] %v3910_v3 }
  0xcd   : > { %496 = vst [vmem:[#allocation1 + $0x10] ss:$2 sm:$0xff] %v3917_v5 }
  0xce   : > { %v482_v30 = vld.sshfl [vmem:[#allocation1] sm:$0xff pattern:$0x75316420]  ;;  %497 = vst [vmem:[#allocation1 + $0x11] ss:$2 sm:$0xff] %v3903_v1  ;;  %461 = vrot.lane.b32.xlu1 %v444_v28, %s3723_s14 }
  0xcf   : > { %494 = vst [vmem:[#allocation1] ss:$2 sm:$0xff] %v3913_v4  ;;  %v450_v29 = vld.sshfl [vmem:[#allocation1 + $0x30] sm:$0xff pattern:$0x75316420] }
  0xd0   : > { %495 = vst [vmem:[#allocation1 + $0x1] ss:$2 sm:$0xff] %v3907_v2 }
  0xd1   : > { %489 = vst [vmem:[#allocation1 + $0x30] ss:$2 sm:$0xff] %v3872_v37 }
  0xd2   : > { %491 = vst [vmem:[#allocation1 + $0x31] ss:$2 sm:$0xff] %v3898_v63 }
  0xd3   : > { %506 = vrot.lane.b32.xlu2 %v482_v30, %s3724_s20  ;;  %v492_v34 = vld.sshfl [vmem:[#allocation1 + $0x20] sm:$0xff pattern:$0x75316420] }
  0xd4   : > { %500 = vst [vmem:[#allocation1 + $0x20] ss:$2 sm:$0xff] %v264_v17 }
  0xd5   : > { %501 = vst [vmem:[#allocation1 + $0x21] ss:$2 sm:$0xff] %v3934_v15  ;;  %v499_v38 = vld.sshfl [vmem:[#allocation1 + $0x10] sm:$0xff pattern:$0x75316420] }
  0xd6   : > { %465 = vrot.lane.b32.xlu1 %v450_v29, %s3723_s14 }
  0xd7   : > { %v498_v35 = vld.sshfl [vmem:[#allocation1] sm:$0xff pattern:$0x75316420] }
  0xd8   : > { %514 = vrot.lane.b32.xlu0 %v498_v35, %s3724_s20 }
  0xd9   : > { %v493_v36 = vld.sshfl [vmem:[#allocation1 + $0x30] sm:$0xff pattern:$0x75316420] }
  0xda   : > { %502 = vst [vmem:[#allocation1 + $0x30] ss:$2 sm:$0xff] %v3941_v18 }
  0xdb   : > { %510 = vrot.lane.b32.xlu2 %v492_v34, %s3724_s20  ;;  %503 = vst [vmem:[#allocation1 + $0x31] ss:$2 sm:$0xff] %v3930_v14 }
  0xdc   : > { %v504_v37 = vld.sshfl [vmem:[#allocation1 + $0x20] sm:$0xff pattern:$0x75316420] }
  0xde   : > { %518 = vrot.lane.b32.xlu1 %v504_v37, %s3724_s20 }
  0xe0   : > { %516 = vrot.lane.b32.xlu0 %v499_v38, %s3724_s20 }
  0xe2   : > { %v505_v39 = vld.sshfl [vmem:[#allocation1 + $0x30] sm:$0xff pattern:$0x75316420] }
  0xe3   : > { %512 = vrot.lane.b32.xlu2 %v493_v36, %s3724_s20 }
  0xe6   : > { %398 = vrot.lane.b32.xlu1 %v3920_v7, %s3722_s13 }
  0xe8   : > { %520 = vrot.lane.b32.xlu0 %v505_v39, %s3724_s20 }
  0xeb   : > { %453 = vrot.lane.b32.xlu2 %v428_v23, %s3723_s14 }
  0xf0   : > { %508 = vrot.lane.b32.xlu0 %v483_v33, %s3724_s20 }
 0x10c   : > { %v3997_v40 = vpop.permute.xlu2 %406 }
 0x114   : > { %v409_v42 = vpop.permute.xlu2 %408 }
 0x11c   : > { %v452_v45 = vpop.permute.xlu2 %451 }
 0x11d   : > { %v397_v41 = vpop.permute.xlu1 %396 }
 0x11e   : > { %v531_v54 = vsel %vm530_vm1, %v397_v41, %v452_v45 }
 0x120   : > { %v401_v43 = vpop.permute.xlu0 %400 }
 0x125   : > { %v403_v44 = vpop.permute.xlu1 %402  ;;  %v464_v48 = vpop.permute.xlu2 %463 }
 0x126   : > { %v537_v3 = vsel %vm530_vm1, %v409_v42, %v464_v48 }
 0x12a   : > { %v411_v46 = vpop.permute.xlu0 %410 }
 0x12d   : > { %v405_v47 = vpop.permute.xlu1 %404  ;;  %v507_v51 = vpop.permute.xlu2 %506 }
 0x12e   : > { %v540_v55 = vsel %vm539_vm2, %v531_v54, %v507_v51 }
 0x12f   : > { %v550_v60 = vrot.slane %v540_v55, 4 }
 0x134   : > { %v456_v49 = vpop.permute.xlu0 %455 }
 0x135   : > { %v511_v57 = vpop.permute.xlu2 %510  ;;  %v533_v62 = vsel %vm530_vm1, %v401_v43, %v456_v49 }
 0x136   : > { %v542_v0 = vsel %vm539_vm2, %v533_v62, %v511_v57 }
 0x137   : > { %v562_v4 = vrot.slane %v542_v0, 4 }
 0x138   : > { %v460_v50 = vpop.permute.xlu1 %459 }
 0x139   : > { %v535_v58 = vsel %vm530_vm1, %v405_v47, %v460_v50 }
 0x13c   : > { %v458_v53 = vpop.permute.xlu0 %457 }
 0x13d   : > { %v513_v20 = vpop.permute.xlu2 %512  ;;  %v534_v27 = vsel %vm530_vm1, %v403_v44, %v458_v53 }
 0x13e   : > { %v543_v31 = vsel %vm539_vm2, %v534_v27, %v513_v20 }
 0x13f   : > { %v618_v29 = vrot.slane %v543_v31, 4 }
 0x140   : > { %v462_v52 = vpop.permute.xlu1 %461 }
 0x141   : > { %v536_v34 = vsel %vm530_vm1, %v3997_v40, %v462_v52 }
 0x145   : > { %v454_v39 = vpop.permute.xlu2 %453 }
 0x148   : > { %v466_v56 = vpop.permute.xlu1 %465 }
 0x149   : > { %v538_v32 = vsel %vm530_vm1, %v411_v46, %v466_v56 }
 0x14a   : > { %v515_v59 = vpop.permute.xlu0 %514 }
 0x14b   : > { %v544_v61 = vsel %vm539_vm2, %v535_v58, %v515_v59 }
 0x14c   : > { %v548_v63 = vrot.slane %v544_v61, 4  ;;  %v551_v1 = vsel %vm237_vm0, %v544_v61, %v550_v60 }
 0x14d   : > { %v559_v5 = vperm.slane %v551_v1, %v3843_v11 }
 0x14e   : > { %v549_v2 = vsel %vm237_vm0, %v548_v63, %v540_v55 }
 0x14f   : > { %v555_v7 = vperm.slane %v549_v2, %v3843_v11  ;;  %v586_v14 = vrot.slane %v559_v5, 4 }
 0x150   : > { %v519_v6 = vpop.permute.xlu1 %518 }
 0x151   : > { %v546_v8 = vsel %vm539_vm2, %v537_v3, %v519_v6  ;;  %v574_v18 = vrot.slane %v555_v7, 4 }
 0x152   : > { %v517_v9 = vpop.permute.xlu0 %516  ;;  %v560_v10 = vrot.slane %v546_v8, 4  ;;  %v563_v12 = vsel %vm237_vm0, %v546_v8, %v562_v4 }
 0x153   : > { %v571_v13 = vperm.slane %v563_v12, %v3843_v11  ;;  %v545_v35 = vsel %vm539_vm2, %v536_v34, %v517_v9 }
 0x154   : > { %v561_v15 = vsel %vm237_vm0, %v560_v10, %v542_v0  ;;  %v604_v42 = vrot.slane %v545_v35, 4 }
 0x155   : > { %v567_v16 = vperm.slane %v561_v15, %v3843_v11  ;;  %v584_v17 = vrot.slane %v571_v13, 4  ;;  %v587_v19 = vsel %vm237_vm0, %v571_v13, %v586_v14 }
 0x156   : > { %v4023_v26 = vperm.slane %v587_v19, %v3853_v24 }
 0x157   : > { %v585_v21 = vsel %vm237_vm0, %v584_v17, %v559_v5  ;;  %v575_v22 = vsel %vm237_vm0, %v567_v16, %v574_v18  ;;  %v572_v50 = vrot.slane %v567_v16, 4 }
 0x158   : > { %v591_v23 = vperm.slane %v585_v21, %v3853_v24  ;;  %v4020_v25 = vperm.slane %v575_v22, %v3853_v24  ;;  %v602_v30 = vrot.slane %v4023_v26, 4  ;;  %v399_v36 = vpop.permute.xlu1 %398 }
 0x159   : > { %v532_v43 = vsel %vm530_vm1, %v399_v36, %v454_v39  ;;  %v573_v60 = vsel %vm237_vm0, %v572_v50, %v555_v7 }
 0x15a   : > { %v521_v28 = vpop.permute.xlu0 %520  ;;  %673 = vrot.lane.b32.xlu1 %v591_v23, %s3725_s22  ;;  %665 = vrot.lane.b32.xlu0 %v4020_v25, %s3726_s23  ;;  %v603_v41 = vsel %vm237_vm0, 0.0, %v602_v30  ;;  %v579_v0 = vperm.slane %v573_v60, %v3853_v24  ;;  %v600_v1 = vrot.slane %v591_v23, 4  ;;  %v598_v8 = vrot.slane %v4020_v25, 4 }
 0x15b   : > { %v547_v33 = vsel %vm539_vm2, %v538_v32, %v521_v28 }
 0x15c   : > { %v616_v37 = vrot.slane %v547_v33, 4  ;;  %v619_v38 = vsel %vm237_vm0, %v547_v33, %v618_v29  ;;  %v596_v4 = vrot.slane %v579_v0, 4  ;;  %v601_v5 = vsel %vm237_vm0, 0.0, %v600_v1 }
 0x15d   : > { %v627_v45 = vperm.slane %v619_v38, %v3843_v11  ;;  %v599_v12 = vsel %vm237_vm0, 0.0, %v598_v8 }
 0x15e   : > { %v617_v46 = vsel %vm237_vm0, %v616_v37, %v543_v31  ;;  %v597_v7 = vsel %vm237_vm0, 0.0, %v596_v4 }
 0x15f   : > { %v623_v52 = vperm.slane %v617_v46, %v3843_v11  ;;  %v640_v53 = vrot.slane %v627_v45, 4 }
 0x161   : > { %v628_v62 = vrot.slane %v623_v52, 4 }
 0x162   : > { %v509_v44 = vpop.permute.xlu0 %508  ;;  %685 = vrot.lane.b32.xlu1 %v603_v41, %s4808_s27 }
 0x163   : > { %v541_v40 = vsel %vm539_vm2, %v532_v43, %v509_v44 }
 0x164   : > { %v605_v47 = vsel %vm237_vm0, %v604_v42, %v541_v40  ;;  %v606_v48 = vrot.slane %v541_v40, 4 }
 0x165   : > { %v611_v49 = vperm.slane %v605_v47, %v3843_v11 }
 0x166   : > { %v607_v51 = vsel %vm237_vm0, %v545_v35, %v606_v48 }
 0x167   : > { %v615_v54 = vperm.slane %v607_v51, %v3843_v11  ;;  %v630_v55 = vrot.slane %v611_v49, 4  ;;  %v629_v2 = vsel %vm237_vm0, %v628_v62, %v611_v49 }
 0x168   : > { %v635_v3 = vperm.slane %v629_v2, %v3853_v24 }
 0x169   : > { %v641_v56 = vsel %vm237_vm0, %v640_v53, %v615_v54  ;;  %v631_v57 = vsel %vm237_vm0, %v623_v52, %v630_v55  ;;  %v642_v6 = vrot.slane %v615_v54, 4 }
 0x16a   : > { %v647_v58 = vperm.slane %v641_v56, %v3853_v24  ;;  %v639_v59 = vperm.slane %v631_v57, %v3853_v24  ;;  %v652_v9 = vrot.slane %v635_v3, 4 }
 0x16b   : > { %v643_v10 = vsel %vm237_vm0, %v627_v45, %v642_v6 }
 0x16c   : > { %705 = vrot.lane.b32.xlu0 %v647_v58, %s4789_s28  ;;  %697 = vrot.lane.b32.xlu2 %v639_v59, %s4788_s29  ;;  %v654_v61 = vrot.slane %v639_v59, 4  ;;  %v653_v13 = vsel %vm237_vm0, 0.0, %v652_v9  ;;  %v651_v14 = vperm.slane %v643_v10, %v3853_v24  ;;  %v656_v15 = vrot.slane %v647_v58, 4  ;;  %s4793_s29 = smov 14   ;;  %s4802_s28 = smov 108  }
 0x16e   : > { %v655_v63 = vsel %vm237_vm0, 0.0, %v654_v61  ;;  %v658_v16 = vrot.slane %v651_v14, 4  ;;  %v657_v17 = vsel %vm237_vm0, 0.0, %v656_v15 }
 0x16f   : > { %701 = vrot.lane.b32.xlu1 %v655_v63, %s4787_s30  ;;  %s4798_s30 = smov 106  }
 0x170   : > { %v659_v18 = vsel %vm237_vm0, 0.0, %v658_v16 }
 0x174   : > { %677 = vrot.lane.b32.xlu0 %v601_v5, %s4821_s10  ;;  %689 = vrot.lane.b32.xlu2 %v635_v3, %s4823_s9  ;;  %s3749_s9 = smov 76  }
 0x177   : > { %661 = vrot.lane.b32.xlu1 %v597_v7, %s3732_s6 }
 0x17c   : > { %669 = vrot.lane.b32.xlu2 %v599_v12, %s4804_s11  ;;  %693 = vrot.lane.b32.xlu0 %v653_v13, %s4807_s8  ;;  %s3743_s8 = smov 4  }
 0x17f   : > { %713 = vrot.lane.b32.xlu1 %v651_v14, %s4799_s12  ;;  %s3741_s12 = smov 92  }
 0x184   : > { %709 = vrot.lane.b32.xlu2 %v657_v17, %s4798_s30  ;;  %717 = vrot.lane.b32.xlu0 %v659_v18, %s4793_s29  ;;  %s4826_s29 = smov 110   ;;  %s4800_s30 = smov 109  }
 0x18c   : > { %681 = vrot.lane.b32.xlu2 %v4023_v26, %s4802_s28 }
 0x1c6   : > { %v698_v19 = vpop.permute.xlu2 %697 }
 0x1cc   : > { %v674_v20 = vpop.permute.xlu1 %673  ;;  %v666_v22 = vpop.permute.xlu0 %665 }
 0x1ce   : > { %v690_v21 = vpop.permute.xlu2 %689 }
 0x1d4   : > { %v686_v23 = vpop.permute.xlu1 %685 }
 0x1d5   : > { %v735_v35 = vsel %vm4837_vm7, %v686_v23, %v690_v21 }
 0x1d6   : > { %v670_v25 = vpop.permute.xlu2 %669 }
 0x1de   : > { %v706_v27 = vpop.permute.xlu0 %705  ;;  %v710_v32 = vpop.permute.xlu2 %709 }
 0x1e1   : > { %v702_v28 = vpop.permute.xlu1 %701 }
 0x1e6   : > { %v678_v31 = vpop.permute.xlu0 %677  ;;  %v682_v42 = vpop.permute.xlu2 %681 }
 0x1e9   : > { %v662_v33 = vpop.permute.xlu1 %661 }
 0x1ea   : > { %v721_v30 = vsel %vm720_vm3, %v579_v0, %v662_v33 }
 0x1eb   : > { %v723_v26 = vsel %vm4791_vm4, %v721_v30, %v666_v22  ;;  %vm754_vm4 = vcmask 1043456  }
 0x1ec   : > { %v725_v29 = vsel %vm724_vm5, %v723_v26, %v670_v25 }
 0x1ed   : > { %v727_v34 = vsel %vm4790_vm6, %v725_v29, %v674_v20  ;;  %vm4817_vm6 = vcmask 1031168  }
 0x1ee   : > { %v694_v36 = vpop.permute.xlu0 %693  ;;  %v729_v39 = vsel %vm728_vm10, %v727_v34, %v678_v31 }
 0x1ef   : > { %v737_v37 = vsel %vm736_vm8, %v735_v35, %v694_v36  ;;  %v731_v40 = vsel %vm4818_vm14, %v729_v39, %v682_v42  ;;  %v3432_v39 = vld [vmem:[%s4773_s1 + $0x4] sm:$0xf] }
 0x1f0   : > { %v739_v38 = vsel %vm4792_vm9, %v737_v37, %v698_v19  ;;  %vm4797_vm9 = vcmask 113664   ;;  %v733_v49 = vsel %vm4817_vm6, %v731_v40, %v686_v23 }
 0x1f1   : > { %v741_v41 = vsel %vm740_vm11, %v739_v38, %v702_v28  ;;  %v714_v44 = vpop.permute.xlu1 %713 }
 0x1f2   : > { %v743_v43 = vsel %vm4796_vm12, %v741_v41, %v706_v27  ;;  %vm4810_vm12 = vcmask 404480   ;;  %v786_v41 = vld [vmem:[%s4773_s1] sm:$0xf] }
 0x1f3   : > { %v745_v45 = vsel %vm4795_vm13, %v743_v43, %v710_v32 }
 0x1f4   : > { %v747_v46 = vsel %vm4794_vm15, %v745_v45, %v714_v44  ;;  %vm765_vm15 = vcmask 1043600  }
 0x1f5   : > { %v753_v47 = vrot.slane %v747_v46, 4  ;;  %vm4101_vm13 = vmor %vm237_vm0, %vm765_vm15  ;;  %vm4812_vm15 = vcmask 142336  }
 0x1f6   : > { %v718_v48 = vpop.permute.xlu0 %717 }
 0x1f7   : > { %v755_v50 = vsel %vm754_vm4, %v733_v49, %v753_v47  ;;  %v749_v51 = vsel %vm4797_vm9, %v714_v44, %v718_v48  ;;  %vm4806_vm9 = vcmask 552336  }
 0x1f8   : > { %756 = vrot.lane.b32.xlu1 %v755_v50, %s3732_s6  ;;  %758 = vrot.lane.b32.xlu0 %v749_v51, %s3732_s6  ;;  %v775_v52 = vrot.slane %v749_v51, 4 }
 0x1fa   : > { %v776_v53 = vsel %vm754_vm4, %v747_v46, %v775_v52 }
 0x1fb   : > { %777 = vrot.lane.b32.xlu2 %v776_v53, %s4804_s11  ;;  %s4825_s11 = smov 38  }
 0x200   : > { %770 = vrot.lane.b32.xlu1 %v733_v49, %s4826_s29  ;;  %v3445_v49 = vld [vmem:[%s4773_s1 + $0x8] sm:$0xf] }
 0x255   : > { %v778_v54 = vpop.permute.xlu2 %777 }
 0x256   : > { %v779_v56 = vrot.slane %v778_v54, 4 }
 0x258   : > { %v780_v62 = vsel %vm724_vm5, %v778_v54, %v779_v56  ;;  %v3452_v54 = vld [vmem:[%s4773_s1 + $0xc] sm:$0xf] }
 0x26a   : > { %v757_v55 = vpop.permute.xlu1 %756  ;;  %v759_v59 = vpop.permute.xlu0 %758 }
 0x26b   : > { %v760_v58 = vrot.slane %v757_v55, 4 }
 0x26d   : > { %v761_v60 = vsel %vm720_vm3, %v760_v58, %v757_v55  ;;  %v762_v61 = vsel %vm720_vm3, %v760_v58, %v759_v59 }
 0x26e   : > { %767 = vst.msk [vmem:[#allocation2] sm:$0xff] %vm4101_vm13, %v761_v60 }
 0x26f   : > { %769 = vst.msk [vmem:[#allocation2 + $0x8] sm:$0xf] %vm4810_vm12, %v762_v61  ;;  %vm4811_vm12 = vcmask 1039360   ;;  %v3459_v61 = vld [vmem:[%s4773_s1 + $0x10] sm:$0xf] }
 0x270   : > { %783 = vst.msk [vmem:[#allocation2 + $0x8] sm:$0xf] %vm4806_vm9, %v780_v62  ;;  %vm806_vm9 = vcmask 31744  }
 0x272   : > { %v771_v63 = vpop.permute.xlu1 %770 }
 0x273   : > { %774 = vst.msk [vmem:[#allocation2] sm:$0xf] %vm4812_vm15, %v771_v63  ;;  %vm4813_vm15 = vcmask 891904  }
 0x277   : > { %v785_v0 = vld [vmem:[#allocation2 + $0x8] sm:$0xf] }
 0x278   : > { %793 = vst [vmem:[#allocation1 + $0x10] ss:$2 sm:$0xff] %v785_v0  ;;  %v952_v6 = vld [vmem:[#allocation2 + $0x8] sm:$0xf] }
 0x279   : > { %v1044_v9 = vld [vmem:[#allocation2 + $0x8] sm:$0xf] }
 0x27a   : > { %v4113_v1 = vld [vmem:[#allocation2] sm:$0xff]  ;;  %v1137_v14 = vld [vmem:[#allocation2 + $0x8] sm:$0xf] }
 0x27b   : > { %791 = vst [vmem:[#allocation1] ss:$2 sm:$0xff] %v4113_v1  ;;  %v1230_v18 = vld [vmem:[#allocation2 + $0x8] sm:$0xf] }
 0x27c   : > { %v1322_v22 = vld [vmem:[#allocation2 + $0x8] sm:$0xf] }
 0x27d   : > { %v1415_v28 = vld [vmem:[#allocation2 + $0x8] sm:$0xf] }
 0x27e   : > { %v1508_v30 = vld [vmem:[#allocation2 + $0x8] sm:$0xf] }
 0x27f   : > { %v796_v2 = vld.sshfl [vmem:[#allocation1 + $0x10] sm:$0xff pattern:$0x75316420] }
 0x280   : > { %878 = vst [vmem:[#allocation1 + $0x10] ss:$2 sm:$0xff] %v785_v0  ;;  %801 = vrot.lane.b32.xlu2 %v796_v2, %s3722_s13 }
 0x282   : > { %v794_v3 = vld.sshfl [vmem:[#allocation1] sm:$0xff pattern:$0x75316420]  ;;  %v795_v4 = vld.sshfl [vmem:[#allocation1 + $0x8] sm:$0xff pattern:$0x75316420] }
 0x283   : > { %876 = vst [vmem:[#allocation1] ss:$2 sm:$0xff] %v4113_v1  ;;  %799 = vrot.lane.b32.xlu1 %v795_v4, %s3722_s13  ;;  %797 = vrot.lane.b32.xlu0 %v794_v3, %s3722_s13  ;;  %v3466_v3 = vld [vmem:[%s4773_s1 + $0x14] sm:$0xf] }
 0x287   : > { %v4120_v5 = vld.sshfl [vmem:[#allocation1 + $0x10] sm:$0xff pattern:$0x75316420] }
 0x288   : > { %959 = vst [vmem:[#allocation1 + $0x10] ss:$2 sm:$0xff] %v952_v6 }
 0x28a   : > { %v879_v7 = vld.sshfl [vmem:[#allocation1] sm:$0xff pattern:$0x75316420]  ;;  %v4122_v8 = vld.sshfl [vmem:[#allocation1 + $0x8] sm:$0xff pattern:$0x75316420] }
 0x28b   : > { %957 = vst [vmem:[#allocation1] ss:$2 sm:$0xff] %v4113_v1  ;;  %3439 = vmatpush.msk.msra.mxu3 %vm754_vm4, %v879_v7 }
 0x28c   : > { %3440 = vmatmul.msk.f32.vlgmr.msra.gmra.mxu3 %vm806_vm9, %v786_v41 }
 0x28f   : > { %v962_v10 = vld.sshfl [vmem:[#allocation1 + $0x10] sm:$0xff pattern:$0x75316420] }
 0x290   : > { %967 = vrot.lane.b32.xlu1 %v962_v10, %s4808_s27  ;;  %1051 = vst [vmem:[#allocation1 + $0x10] ss:$2 sm:$0xff] %v1044_v9 }
 0x292   : > { %v961_v12 = vld.sshfl [vmem:[#allocation1 + $0x8] sm:$0xff pattern:$0x75316420]  ;;  %v960_v13 = vld.sshfl [vmem:[#allocation1] sm:$0xff pattern:$0x75316420] }
 0x293   : > { %965 = vrot.lane.b32.xlu0 %v961_v12, %s4808_s27  ;;  %963 = vrot.lane.b32.xlu2 %v960_v13, %s4808_s27  ;;  %1049 = vst [vmem:[#allocation1] ss:$2 sm:$0xff] %v4113_v1  ;;  %s3745_s27 = smov 2  }
 0x297   : > { %v1054_v15 = vld.sshfl [vmem:[#allocation1 + $0x10] sm:$0xff pattern:$0x75316420] }
 0x298   : > { %1144 = vst [vmem:[#allocation1 + $0x10] ss:$2 sm:$0xff] %v1137_v14 }
 0x29a   : > { %v1053_v16 = vld.sshfl [vmem:[#allocation1 + $0x8] sm:$0xff pattern:$0x75316420]  ;;  %v1052_v17 = vld.sshfl [vmem:[#allocation1] sm:$0xff pattern:$0x75316420] }
 0x29b   : > { %1057 = vrot.lane.b32.xlu2 %v1053_v16, %s4826_s29  ;;  %1055 = vrot.lane.b32.xlu1 %v1052_v17, %s4826_s29  ;;  %1142 = vst [vmem:[#allocation1] ss:$2 sm:$0xff] %v4113_v1  ;;  %v3480_v16 = vld [vmem:[%s4773_s1 + $0x1c] sm:$0xf] }
 0x29c   : > { %1059 = vrot.lane.b32.xlu0 %v1054_v15, %s4826_s29 }
 0x29f   : > { %v1147_v19 = vld.sshfl [vmem:[#allocation1 + $0x10] sm:$0xff pattern:$0x75316420] }
 0x2a0   : > { %1237 = vst [vmem:[#allocation1 + $0x10] ss:$2 sm:$0xff] %v1230_v18 }
 0x2a2   : > { %v1146_v20 = vld.sshfl [vmem:[#allocation1 + $0x8] sm:$0xff pattern:$0x75316420]  ;;  %v1145_v21 = vld.sshfl [vmem:[#allocation1] sm:$0xff pattern:$0x75316420] }
 0x2a3   : > { %1150 = vrot.lane.b32.xlu1 %v1146_v20, %s4800_s30  ;;  %1235 = vst [vmem:[#allocation1] ss:$2 sm:$0xff] %v4113_v1  ;;  %1152 = vrot.lane.b32.xlu2 %v1147_v19, %s4800_s30  ;;  %v3487_v20 = vld [vmem:[%s4773_s1 + $0x20] sm:$0xf] }
 0x2a4   : > { %1148 = vrot.lane.b32.xlu0 %v1145_v21, %s4800_s30  ;;  %s4819_s30 = smov 91  }
 0x2a7   : > { %v1240_v23 = vld.sshfl [vmem:[#allocation1 + $0x10] sm:$0xff pattern:$0x75316420] }
 0x2a8   : > { %1329 = vst [vmem:[#allocation1 + $0x10] ss:$2 sm:$0xff] %v1322_v22 }
 0x2aa   : > { %v1239_v25 = vld.sshfl [vmem:[#allocation1 + $0x8] sm:$0xff pattern:$0x75316420]  ;;  %v1238_v27 = vld.sshfl [vmem:[#allocation1] sm:$0xff pattern:$0x75316420] }
 0x2ab   : > { %1241 = vrot.lane.b32.xlu2 %v1238_v27, %s4802_s28  ;;  %1327 = vst [vmem:[#allocation1] ss:$2 sm:$0xff] %v4113_v1 }
 0x2ac   : > { %1243 = vrot.lane.b32.xlu0 %v1239_v25, %s4802_s28 }
 0x2af   : > { %v1332_v31 = vld.sshfl [vmem:[#allocation1 + $0x10] sm:$0xff pattern:$0x75316420] }
 0x2b0   : > { %1422 = vst [vmem:[#allocation1 + $0x10] ss:$2 sm:$0xff] %v1415_v28 }
 0x2b2   : > { %v1330_v32 = vld.sshfl [vmem:[#allocation1] sm:$0xff pattern:$0x75316420]  ;;  %v1331_v33 = vld.sshfl [vmem:[#allocation1 + $0x8] sm:$0xff pattern:$0x75316420] }
 0x2b3   : > { %1333 = vrot.lane.b32.xlu1 %v1330_v32, %s3741_s12  ;;  %1335 = vrot.lane.b32.xlu2 %v1331_v33, %s3741_s12  ;;  %1420 = vst [vmem:[#allocation1] ss:$2 sm:$0xff] %v4113_v1 }
 0x2b4   : > { %1245 = vrot.lane.b32.xlu0 %v1240_v23, %s4802_s28  ;;  %s4828_s28 = smov 58  }
 0x2b7   : > { %v1425_v26 = vld.sshfl [vmem:[#allocation1 + $0x10] sm:$0xff pattern:$0x75316420] }
 0x2b8   : > { %1515 = vst [vmem:[#allocation1 + $0x10] ss:$2 sm:$0xff] %v1508_v30 }
 0x2ba   : > { %v1424_v29 = vld.sshfl [vmem:[#allocation1 + $0x8] sm:$0xff pattern:$0x75316420]  ;;  %v1423_v34 = vld.sshfl [vmem:[#allocation1] sm:$0xff pattern:$0x75316420] }
 0x2bb   : > { %1428 = vrot.lane.b32.xlu2 %v1424_v29, %s4819_s30  ;;  %1337 = vrot.lane.b32.xlu1 %v1332_v31, %s3741_s12  ;;  %1513 = vst [vmem:[#allocation1] ss:$2 sm:$0xff] %v4113_v1 }
 0x2bc   : > { %1430 = vrot.lane.b32.xlu0 %v1425_v26, %s4819_s30 }
 0x2bf   : > { %v1518_v36 = vld.sshfl [vmem:[#allocation1 + $0x10] sm:$0xff pattern:$0x75316420] }
 0x2c2   : > { %v1516_v35 = vld.sshfl [vmem:[#allocation1] sm:$0xff pattern:$0x75316420]  ;;  %v1517_v37 = vld.sshfl [vmem:[#allocation1 + $0x8] sm:$0xff pattern:$0x75316420] }
 0x2c3   : > { %1426 = vrot.lane.b32.xlu1 %v1423_v34, %s4819_s30  ;;  %1523 = vrot.lane.b32.xlu2 %v1518_v36, %s4821_s10  ;;  %s4829_s30 = smov 40  }
 0x2c4   : > { %1519 = vrot.lane.b32.xlu0 %v1516_v35, %s4821_s10 }
 0x2cb   : > { %1521 = vrot.lane.b32.xlu1 %v1517_v37, %s4821_s10  ;;  %s4831_s10 = smov 94  }
 0x2da   : > { %v802_v38 = vpop.permute.xlu2 %801 }
 0x2db   : > { %3437 = vmatpush.msk.msra.mxu2 %vm754_vm4, %v802_v38 }
 0x2dc   : > { %3438 = vmatmul.msk.f32.vlgmr.msra.gmra.mxu2 %vm806_vm9, %v3432_v39 }
 0x2ed   : > { %v964_v42 = vpop.permute.xlu2 %963 }
 0x2f5   : > { %v800_v43 = vpop.permute.xlu1 %799  ;;  %v798_v44 = vpop.permute.xlu0 %797 }
 0x2f6   : > { %v804_v45 = vsel %vm4811_vm12, %v798_v44, %v800_v43  ;;  %v805_v40 = vsel %vm4811_vm12, %v800_v43, %v802_v38  ;;  %v1058_v46 = vpop.permute.xlu2 %1057  ;;  %vm4814_vm12 = vcmask 900096  }
 0x2f7   : > { %3433 = vmatpush.msk.msra.mxu0 %vm754_vm4, %v804_v45  ;;  %3435 = vmatpush.msk.msra.mxu1 %vm754_vm4, %v805_v40 }
 0x2f8   : > { %3434 = vmatmul.msk.f32.vlgmr.msra.gmra.mxu0 %vm806_vm9, %v3432_v39  ;;  %3436 = vmatmul.msk.f32.vlgmr.msra.gmra.mxu1 %vm806_vm9, %v3432_v39 }
 0x2f9   : > { %3441 = vmatpush.msk.msrb.mxu0 %vm754_vm4, %v4122_v8  ;;  %3443 = vmatpush.msk.msrb.mxu1 %vm754_vm4, %v4120_v5  ;;  %v3473_v8 = vld [vmem:[%s4773_s1 + $0x18] sm:$0xf] }
 0x2fe   : > { %v1153_v52 = vpop.permute.xlu2 %1152 }
 0x300   : > { %3442 = vmatmul.msk.f32.vlgmr.msrb.gmra.mxu0 %vm806_vm9, %v786_v41  ;;  %3444 = vmatmul.msk.f32.vlgmr.msrb.gmra.mxu1 %vm806_vm9, %v786_v41 }
 0x302   : > { %v968_v47 = vpop.permute.xlu1 %967 }
 0x303   : > { %3450 = vmatpush.msk.msra.mxu0 %vm754_vm4, %v968_v47 }
 0x305   : > { %v966_v48 = vpop.permute.xlu0 %965 }
 0x306   : > { %v969_v50 = vsel %vm4817_vm6, %v964_v42, %v966_v48  ;;  %v970_v51 = vsel %vm4817_vm6, %v966_v48, %v968_v47  ;;  %v1242_v59 = vpop.permute.xlu2 %1241 }
 0x307   : > { %3446 = vmatpush.msk.msrb.mxu2 %vm754_vm4, %v969_v50  ;;  %3448 = vmatpush.msk.msrb.mxu3 %vm754_vm4, %v970_v51 }
 0x308   : > { %3447 = vmatmul.msk.f32.vlgmr.msrb.gmra.mxu2 %vm806_vm9, %v3445_v49  ;;  %3449 = vmatmul.msk.f32.vlgmr.msrb.gmra.mxu3 %vm806_vm9, %v3445_v49 }
 0x309   : > { %3451 = vmatmul.msk.f32.vlgmr.msra.gmra.mxu0 %vm806_vm9, %v3445_v49 }
 0x30d   : > { %v1056_v53 = vpop.permute.xlu1 %1055 }
 0x30e   : > { %v1062_v55 = vsel %vm4814_vm12, %v1056_v53, %v1058_v46  ;;  %v1060_v56 = vpop.permute.xlu0 %1059  ;;  %v1336_v1 = vpop.permute.xlu2 %1335 }
 0x30f   : > { %v1063_v58 = vsel %vm4814_vm12, %v1058_v46, %v1060_v56  ;;  %3457 = vmatpush.msk.msra.mxu3 %vm754_vm4, %v1060_v56  ;;  %3453 = vmatpush.msk.msra.mxu1 %vm754_vm4, %v1062_v55  ;;  %vm4815_vm12 = vcmask 744448   ;;  %v908_v32 = vpop.f32.mrf.mxu3 }
 0x310   : > { %3455 = vmatpush.msk.msra.mxu2 %vm754_vm4, %v1063_v58  ;;  %3454 = vmatmul.msk.f32.vlgmr.msra.gmra.mxu1 %vm806_vm9, %v3452_v54 }
 0x311   : > { %3456 = vmatmul.msk.f32.vlgmr.msra.gmra.mxu2 %vm806_vm9, %v3452_v54  ;;  %3458 = vmatmul.msk.f32.vlgmr.msra.gmra.mxu3 %vm806_vm9, %v3452_v54 }
 0x312   : > { %3464 = vmatpush.msk.msrb.mxu2 %vm754_vm4, %v1153_v52 }
 0x315   : > { %v1151_v60 = vpop.permute.xlu1 %1150 }
 0x316   : > { %v1156_v62 = vsel %vm4813_vm15, %v1151_v60, %v1153_v52  ;;  %v1149_v63 = vpop.permute.xlu0 %1148  ;;  %v1429_v9 = vpop.permute.xlu2 %1428 }
 0x317   : > { %v1155_v0 = vsel %vm4813_vm15, %v1149_v63, %v1151_v60  ;;  %3462 = vmatpush.msk.msrb.mxu1 %vm754_vm4, %v1156_v62  ;;  %vm4816_vm15 = vcmask 752640  }
 0x318   : > { %3460 = vmatpush.msk.msrb.mxu0 %vm754_vm4, %v1155_v0  ;;  %3463 = vmatmul.msk.f32.vlgmr.msrb.gmra.mxu1 %vm806_vm9, %v3459_v61 }
 0x319   : > { %3461 = vmatmul.msk.f32.vlgmr.msrb.gmra.mxu0 %vm806_vm9, %v3459_v61  ;;  %3465 = vmatmul.msk.f32.vlgmr.msrb.gmra.mxu2 %vm806_vm9, %v3459_v61 }
 0x31e   : > { %v1244_v2 = vpop.permute.xlu0 %1243  ;;  %v1524_v17 = vpop.permute.xlu2 %1523 }
 0x31f   : > { %v1247_v4 = vsel %vm4818_vm14, %v1242_v59, %v1244_v2 }
 0x320   : > { %3467 = vmatpush.msk.msrb.mxu3 %vm754_vm4, %v1247_v4 }
 0x321   : > { %3468 = vmatmul.msk.f32.vlgmr.msrb.gmra.mxu3 %vm806_vm9, %v3466_v3 }
 0x325   : > { %v1334_v5 = vpop.permute.xlu1 %1333 }
 0x326   : > { %v1340_v6 = vsel %vm4816_vm15, %v1334_v5, %v1336_v1  ;;  %v1246_v7 = vpop.permute.xlu0 %1245 }
 0x327   : > { %v1248_v10 = vsel %vm4818_vm14, %v1244_v2, %v1246_v7  ;;  %3471 = vmatpush.msk.msra.mxu1 %vm754_vm4, %v1246_v7  ;;  %3474 = vmatpush.msk.msra.mxu2 %vm754_vm4, %v1340_v6  ;;  %v197_v2 = vld [vmem:[%s4775_s3] sm:$0x7] }
 0x328   : > { %3469 = vmatpush.msk.msra.mxu0 %vm754_vm4, %v1248_v10  ;;  %3472 = vmatmul.msk.f32.vlgmr.msra.gmra.mxu1 %vm806_vm9, %v3466_v3  ;;  %v4254_v6 = vperm.slane %v197_v2, 0  ;;  %v4256_v10 = vperm.slane %v197_v2, 1 }
 0x329   : > { %3470 = vmatmul.msk.f32.vlgmr.msra.gmra.mxu0 %vm806_vm9, %v3466_v3  ;;  %3475 = vmatmul.msk.f32.vlgmr.msra.gmra.mxu2 %vm806_vm9, %v3473_v8 }
 0x32d   : > { %v1338_v12 = vpop.permute.xlu1 %1337 }
 0x32e   : > { %v1341_v13 = vsel %vm4816_vm15, %v1336_v1, %v1338_v12  ;;  %v1431_v14 = vpop.permute.xlu0 %1430  ;;  %3478 = vmatpush.msk.msrb.mxu0 %vm754_vm4, %v1338_v12 }
 0x32f   : > { %v1434_v15 = vsel %vm4815_vm12, %v1429_v9, %v1431_v14  ;;  %3476 = vmatpush.msk.msra.mxu3 %vm754_vm4, %v1341_v13 }
 0x330   : > { %3483 = vmatpush.msk.msrb.mxu2 %vm754_vm4, %v1434_v15  ;;  %3477 = vmatmul.msk.f32.vlgmr.msra.gmra.mxu3 %vm806_vm9, %v3473_v8 }
 0x331   : > { %3479 = vmatmul.msk.f32.vlgmr.msrb.gmra.mxu0 %vm806_vm9, %v3473_v8  ;;  %3485 = vmatpush.msk.msrb.mxu3 %vm754_vm4, %v1431_v14  ;;  %v4258_v14 = vperm.slane %v197_v2, 2 }
 0x332   : > { %3492 = vmatpush.msk.msra.mxu2 %vm754_vm4, %v1524_v17 }
 0x333   : > { %3484 = vmatmul.msk.f32.vlgmr.msrb.gmra.mxu2 %vm806_vm9, %v3480_v16 }
 0x335   : > { %v1427_v18 = vpop.permute.xlu1 %1426 }
 0x336   : > { %v1433_v19 = vsel %vm4815_vm12, %v1427_v18, %v1429_v9  ;;  %v1520_v21 = vpop.permute.xlu0 %1519  ;;  %vm1612_vm12 = vcmask 240640  }
 0x337   : > { %3481 = vmatpush.msk.msrb.mxu1 %vm754_vm4, %v1433_v19 }
 0x338   : > { %3482 = vmatmul.msk.f32.vlgmr.msrb.gmra.mxu1 %vm806_vm9, %v3480_v16  ;;  %3486 = vmatmul.msk.f32.vlgmr.msrb.gmra.mxu3 %vm806_vm9, %v3480_v16 }
 0x33b   : > { %3493 = vmatmul.msk.f32.vlgmr.msra.gmra.mxu2 %vm806_vm9, %v3487_v20 }
 0x33d   : > { %v1522_v22 = vpop.permute.xlu1 %1521 }
 0x33e   : > { %v1525_v23 = vsel %vm728_vm10, %v1520_v21, %v1522_v22  ;;  %v1526_v25 = vsel %vm728_vm10, %v1522_v22, %v1524_v17 }
 0x33f   : > { %3488 = vmatpush.msk.msra.mxu0 %vm754_vm4, %v1525_v23  ;;  %3490 = vmatpush.msk.msra.mxu1 %vm754_vm4, %v1526_v25 }
 0x340   : > { %3489 = vmatmul.msk.f32.vlgmr.msra.gmra.mxu0 %vm806_vm9, %v3487_v20  ;;  %3491 = vmatmul.msk.f32.vlgmr.msra.gmra.mxu1 %vm806_vm9, %v3487_v20 }
 0x35f   : > { %v873_v31 = vpop.f32.mrf.mxu2 }
 0x375   : > { %v833_v27 = vpop.f32.mrf.mxu0  ;;  %v853_v28 = vpop.f32.mrf.mxu1 }
 0x376   : > { %v909_v45 = vadd.f32 %v908_v32, %v833_v27 }
 0x37d   : > { %v928_v33 = vpop.f32.mrf.mxu0  ;;  %v948_v30 = vpop.f32.mrf.mxu1 }
 0x37e   : > { %v929_v42 = vadd.f32 %v928_v33, %v853_v28  ;;  %v949_v40 = vadd.f32 %v948_v30, %v873_v31 }
 0x386   : > { %v1037_v34 = vpop.f32.mrf.mxu0 }
 0x387   : > { %v1042_v50 = vadd.f32 %v1037_v34, %v949_v40 }
 0x38b   : > { %v997_v26 = vpop.f32.mrf.mxu2  ;;  %v1017_v29 = vpop.f32.mrf.mxu3 }
 0x38c   : > { %v1041_v47 = vadd.f32 %v1017_v29, %v929_v42  ;;  %v1040_v49 = vadd.f32 %v997_v26, %v909_v45 }
 0x38d   : > { %v1090_v35 = vpop.f32.mrf.mxu1 }
 0x38e   : > { %v1133_v53 = vadd.f32 %v1090_v35, %v1040_v49 }
 0x394   : > { %v1110_v36 = vpop.f32.mrf.mxu2  ;;  %v1130_v37 = vpop.f32.mrf.mxu3 }
 0x395   : > { %v1203_v39 = vpop.f32.mrf.mxu1  ;;  %v1134_v51 = vadd.f32 %v1110_v36, %v1041_v47  ;;  %v1135_v54 = vadd.f32 %v1130_v37, %v1042_v50 }
 0x396   : > { %v1183_v38 = vpop.f32.mrf.mxu0 }
 0x397   : > { %v1227_v55 = vadd.f32 %v1203_v39, %v1134_v51  ;;  %v1226_v59 = vadd.f32 %v1183_v38, %v1133_v53 }
 0x39c   : > { %v1223_v41 = vpop.f32.mrf.mxu2 }
 0x39d   : > { %v1228_v60 = vadd.f32 %v1223_v41, %v1135_v54 }
 0x3a4   : > { %v1275_v43 = vpop.f32.mrf.mxu3 }
 0x3a5   : > { %v1315_v46 = vpop.f32.mrf.mxu1  ;;  %v1318_v63 = vadd.f32 %v1275_v43, %v1226_v59 }
 0x3a6   : > { %v1295_v44 = vpop.f32.mrf.mxu0  ;;  %v1320_v0 = vadd.f32 %v1315_v46, %v1228_v60 }
 0x3a7   : > { %v1319_v61 = vadd.f32 %v1295_v44, %v1227_v55 }
 0x3ac   : > { %v1368_v48 = vpop.f32.mrf.mxu2 }
 0x3ad   : > { %v1411_v3 = vadd.f32 %v1368_v48, %v1318_v63 }
 0x3ae   : > { %v1408_v56 = vpop.f32.mrf.mxu0 }
 0x3af   : > { %v1413_v4 = vadd.f32 %v1408_v56, %v1320_v0 }
 0x3b3   : > { %v1388_v52 = vpop.f32.mrf.mxu3 }
 0x3b4   : > { %v1412_v1 = vadd.f32 %v1388_v52, %v1319_v61 }
 0x3b5   : > { %v1461_v58 = vpop.f32.mrf.mxu1 }
 0x3b6   : > { %v1481_v62 = vpop.f32.mrf.mxu2  ;;  %v1504_v7 = vadd.f32 %v1461_v58, %v1411_v3 }
 0x3b7   : > { %v1505_v8 = vadd.f32 %v1481_v62, %v1412_v1 }
 0x3bb   : > { %v1501_v5 = vpop.f32.mrf.mxu3 }
 0x3bc   : > { %v1506_v9 = vadd.f32 %v1501_v5, %v1413_v4 }
 0x3bd   : > { %v1553_v12 = vpop.f32.mrf.mxu0  ;;  %v1573_v13 = vpop.f32.mrf.mxu1 }
 0x3be   : > { %v1596_v15 = vadd.f32 %v1553_v12, %v1504_v7  ;;  %v1597_v16 = vadd.f32 %v1573_v13, %v1505_v8  ;;  %v1593_v17 = vpop.f32.mrf.mxu2 }
 0x3bf   : > { %v1598_v18 = vadd.f32 %v1593_v17, %v1506_v9 }
 0x3c0   : > { %v1606_v19 = vmul.f32 %v4254_v6, %v1596_v15  ;;  %v1607_v20 = vmul.f32 %v4256_v10, %v1597_v16 }
 0x3c1   : > { %v1608_v21 = vmul.f32 %v4258_v14, %v1598_v18 }
 0x3c2   : > { %v1609_v22 = vsel %vm754_vm4, %v1606_v19, 0.0  ;;  %v1610_v23 = vsel %vm754_vm4, %v1607_v20, 0.0 }
 0x3c3   : > { %v1611_v25 = vadd.f32 %v1610_v23, %v1609_v22  ;;  %v1613_v27 = vsel %vm1612_vm12, %v1608_v21, 0.0 }
 0x3c5   : > { %v1614_v28 = vadd.f32 %v1613_v27, %v1611_v25 }
 0x3c7   : > { %1615 = vadd.xlane.f32.xlu2 %v1614_v28 }
 0x43a   : > { %v1616_v31 = vpop.xlane.xlu2 %1615 }
 0x43b   : > { %v1617_v32 = vmul.f32 0.00390625, %v1616_v31 }
 0x43d   : > { %v1618_v33 = vsub.f32 %v1596_v15, %v1617_v32  ;;  %v1619_v30 = vsub.f32 %v1597_v16, %v1617_v32  ;;  %v1620_v26 = vsub.f32 %v1598_v18, %v1617_v32 }
 0x43f   : > { %v1621_v29 = vmul.f32 %v1618_v33, %v1618_v33  ;;  %v1622_v34 = vmul.f32 %v1619_v30, %v1619_v30  ;;  %v1623_v35 = vmul.f32 %v1620_v26, %v1620_v26 }
 0x441   : > { %v1624_v36 = vmul.f32 %v1621_v29, %v4254_v6  ;;  %v1625_v37 = vmul.f32 %v1622_v34, %v4256_v10  ;;  %v1626_v38 = vmul.f32 %v1623_v35, %v4258_v14 }
 0x443   : > { %v1627_v39 = vsel %vm754_vm4, %v1624_v36, 0.0  ;;  %v1628_v41 = vsel %vm754_vm4, %v1625_v37, 0.0  ;;  %v1630_v43 = vsel %vm1612_vm12, %v1626_v38, 0.0 }
 0x444   : > { %v1629_v42 = vadd.f32 %v1628_v41, %v1627_v39 }
 0x446   : > { %v1631_v44 = vadd.f32 %v1630_v43, %v1629_v42 }
 0x448   : > { %1632 = vadd.xlane.f32.xlu0 %v1631_v44 }
 0x4bb   : > { %v1633_v45 = vpop.xlane.xlu0 %1632 }
 0x4bc   : > { %v1634_v40 = vmul.f32 0.00390625, %v1633_v45 }
 0x4be   : > { %v1635_v46 = vadd.f32 1e-05, %v1634_v40 }
 0x4c0   : > { %3644 = vrsqrt.f32 %v1635_v46  ;;  %vm1642_vm6 = vweird.f32 %v1635_v46 }
 0x4c6   : > { %v3645_v47 = vpop.eup %3644 }
 0x4c7   : > { %v1637_v48 = vmul.f32 %v3645_v47, %v1635_v46  ;;  %vm1643_vm15 = vweird.f32 %v3645_v47 }
 0x4c8   : > { %vm1644_vm14 = vmor %vm1642_vm6, %vm1643_vm15  ;;  %vm1652_vm6 = vcmask 244736   ;;  %vm4856_vm15 = vcmask 719872  }
 0x4c9   : > { %v1638_v49 = vmul.f32 %v3645_v47, %v1637_v48 }
 0x4cb   : > { %v1639_v50 = vmul.f32 0.5, %v1638_v49 }
 0x4cd   : > { %v1640_v51 = vsub.f32 1.5, %v1639_v50 }
 0x4cf   : > { %v1641_v52 = vmul.f32 %v3645_v47, %v1640_v51 }
 0x4d1   : > { %v1645_v53 = vsel %vm1644_vm14, %v3645_v47, %v1641_v52  ;;  %vm4836_vm14 = vcmask 15360  }
 0x4d2   : > { %v1646_v54 = vmul.f32 %v1645_v53, %v1618_v33  ;;  %v1647_v55 = vmul.f32 %v1645_v53, %v1619_v30  ;;  %v1648_v59 = vmul.f32 %v1645_v53, %v1620_v26 }
 0x4d4   : > { %v1649_v56 = vmax.f32 %v1646_v54, 0.0  ;;  %v1650_v58 = vmax.f32 %v1647_v55, 0.0  ;;  %v1651_v60 = vmax.f32 %v1648_v59, 0.0 }
 0x4d6   : > { %1700 = vrot.lane.b32.xlu0 %v1650_v58, %s3743_s8  ;;  %1667 = vrot.lane.b32.xlu2 %v1649_v56, %s4825_s11  ;;  %s4830_s11 = smov 22   ;;  %v1653_v61 = vsel %vm1652_vm6, %v1651_v60, 0.0 }
 0x4d7   : > { %1674 = vrot.lane.b32.xlu1 %v1649_v56, %s3745_s27 }
 0x4de   : > { %1655 = vrot.lane.b32.xlu0 %v1649_v56, %s4826_s29  ;;  %1690 = vrot.lane.b32.xlu2 %v1650_v58, %s4828_s28  ;;  %s3751_s29 = smov 74   ;;  %s4832_s28 = smov 20  }
 0x4df   : > { %1676 = vrot.lane.b32.xlu1 %v1650_v58, %s3745_s27 }
 0x4e6   : > { %1693 = vrot.lane.b32.xlu0 %v1650_v58, %s4829_s30  ;;  %1684 = vrot.lane.b32.xlu2 %v1650_v58, %s4831_s10  ;;  %s3753_s30 = smov 56   ;;  %s4846_s10 = smov 70  }
 0x4e7   : > { %1687 = vrot.lane.b32.xlu1 %v1650_v58, %s3749_s9 }
 0x4ee   : > { %1696 = vrot.lane.b32.xlu2 %v1650_v58, %s4830_s11  ;;  %s4835_s11 = smov 114  }
 0x4ef   : > { %1658 = vrot.lane.b32.xlu1 %v1649_v56, %s3741_s12 }
 0x4f7   : > { %1661 = vrot.lane.b32.xlu1 %v1649_v56, %s3751_s29 }
 0x4ff   : > { %1670 = vrot.lane.b32.xlu1 %v1649_v56, %s4832_s28  ;;  %s4847_s28 = smov 34  }
 0x507   : > { %1681 = vrot.lane.b32.xlu1 %v1650_v58, %s4833_s7  ;;  %s4850_s7 = smov 90  }
 0x50f   : > { %1664 = vrot.lane.b32.xlu1 %v1649_v56, %s3753_s30 }
 0x517   : > { %1702 = vrot.lane.b32.xlu1 %v1653_v61, %s3743_s8 }
 0x51f   : > { %1706 = vrot.lane.b32.xlu1 %v1653_v61, %s4835_s11  ;;  %s4853_s11 = smov 108  }
 0x530   : > { %v1668_v7 = vpop.permute.xlu2 %1667 }
 0x538   : > { %v1691_v20 = vpop.permute.xlu2 %1690 }
 0x539   : > { %v1771_v41 = vrot.slane %v1691_v20, 4 }
 0x540   : > { %v1685_v37 = vpop.permute.xlu2 %1684 }
 0x541   : > { %v1772_v45 = vsel %vm237_vm0, %v1771_v41, %v1685_v37 }
 0x542   : > { %v1776_v49 = vperm.slane %v1772_v45, %v3843_v11 }
 0x548   : > { %v1701_v3 = vpop.permute.xlu0 %1700 }
 0x549   : > { %v1675_v62 = vpop.permute.xlu1 %1674 }
 0x550   : > { %v1656_v12 = vpop.permute.xlu0 %1655 }
 0x551   : > { %v1677_v63 = vpop.permute.xlu1 %1676 }
 0x552   : > { %v1679_v16 = vsel %vm4836_vm14, %v1675_v62, %v1677_v63  ;;  %vm4857_vm14 = vcmask 293888  }
 0x553   : > { %v1727_v19 = vrot.slane %v1679_v16, 4 }
 0x555   : > { %v1728_v27 = vsel %vm237_vm0, %v1727_v19, %v1668_v7 }
 0x556   : > { %v1732_v30 = vperm.slane %v1728_v27, %v3843_v11 }
 0x558   : > { %v1694_v40 = vpop.permute.xlu0 %1693  ;;  %v1745_v50 = vrot.slane %v1732_v30, 4 }
 0x559   : > { %v1688_v0 = vpop.permute.xlu1 %1687 }
 0x55a   : > { %v1765_v32 = vrot.slane %v1688_v0, 4 }
 0x561   : > { %v1659_v1 = vpop.permute.xlu1 %1658 }
 0x562   : > { %v1709_v5 = vrot.slane %v1659_v1, 4  ;;  %v1789_v1 = vrot.slane %v1776_v49, 4 }
 0x564   : > { %v1710_v9 = vsel %vm237_vm0, %v1709_v5, %v1649_v56  ;;  %v1697_v56 = vpop.permute.xlu2 %1696 }
 0x565   : > { %v1714_v17 = vperm.slane %v1710_v9, %v3843_v11 }
 0x567   : > { %v1735_v21 = vrot.slane %v1714_v17, 4 }
 0x569   : > { %v1662_v2 = vpop.permute.xlu1 %1661 }
 0x56a   : > { %v1715_v8 = vrot.slane %v1662_v2, 4 }
 0x56c   : > { %v1716_v15 = vsel %vm237_vm0, %v1715_v8, %v1656_v12 }
 0x56d   : > { %v1720_v18 = vperm.slane %v1716_v15, %v3843_v11 }
 0x56f   : > { %v1736_v25 = vsel %vm237_vm0, %v1720_v18, %v1735_v21  ;;  %v1733_v46 = vrot.slane %v1720_v18, 4 }
 0x570   : > { %v1744_v33 = vperm.slane %v1736_v25, %v3853_v24 }
 0x571   : > { %v1671_v4 = vpop.permute.xlu1 %1670  ;;  %v1734_v53 = vsel %vm237_vm0, %v1733_v46, %v1714_v17 }
 0x572   : > { %v1721_v22 = vrot.slane %v1671_v4, 4  ;;  %v1763_v36 = vrot.slane %v1744_v33, 4  ;;  %v1740_v60 = vperm.slane %v1734_v53, %v3853_v24 }
 0x574   : > { %v1759_v4 = vrot.slane %v1740_v60, 4 }
 0x579   : > { %v1682_v13 = vpop.permute.xlu1 %1681 }
 0x57a   : > { %v1766_v29 = vsel %vm237_vm0, %v1765_v32, %v1682_v13 }
 0x57b   : > { %v1770_v38 = vperm.slane %v1766_v29, %v3843_v11 }
 0x57d   : > { %v1791_v47 = vrot.slane %v1770_v38, 4  ;;  %v1790_v8 = vsel %vm237_vm0, %v1789_v1, %v1770_v38 }
 0x57e   : > { %v1796_v15 = vperm.slane %v1790_v8, %v3853_v24 }
 0x57f   : > { %v1792_v54 = vsel %vm237_vm0, %v1776_v49, %v1791_v47 }
 0x580   : > { %v1800_v61 = vperm.slane %v1792_v54, %v3853_v24  ;;  %v1815_v18 = vrot.slane %v1796_v15, 4 }
 0x581   : > { %v1665_v23 = vpop.permute.xlu1 %1664 }
 0x582   : > { %v1722_v28 = vsel %vm237_vm0, %v1721_v22, %v1665_v23  ;;  %v1819_v7 = vrot.slane %v1800_v61, 4 }
 0x583   : > { %v1726_v31 = vperm.slane %v1722_v28, %v3843_v11 }
 0x585   : > { %v1747_v26 = vrot.slane %v1726_v31, 4  ;;  %v1746_v58 = vsel %vm237_vm0, %v1745_v50, %v1726_v31 }
 0x586   : > { %v1752_v0 = vperm.slane %v1746_v58, %v3853_v24 }
 0x587   : > { %v1748_v34 = vsel %vm237_vm0, %v1732_v30, %v1747_v26 }
 0x588   : > { %v1756_v35 = vperm.slane %v1748_v34, %v3853_v24  ;;  %v1760_v9 = vsel %vm237_vm0, %v1752_v0, %v1759_v4  ;;  %v1757_v21 = vrot.slane %v1752_v0, 4 }
 0x589   : > { %v1703_v39 = vpop.permute.xlu1 %1702 }
 0x58a   : > { %v1704_v42 = vsel %vm806_vm9, %v1701_v3, %v1703_v39  ;;  %v1764_v43 = vsel %vm237_vm0, %v1756_v35, %v1763_v36  ;;  %v1761_v16 = vrot.slane %v1756_v35, 4  ;;  %v1758_v22 = vsel %vm237_vm0, %v1757_v21, %v1740_v60 }
 0x58b   : > { %v1777_v44 = vrot.slane %v1704_v42, 4  ;;  %1841 = vrot.lane.b32.xlu1 %v1764_v43, %s3722_s13 }
 0x58c   : > { %v1762_v19 = vsel %vm237_vm0, %v1761_v16, %v1744_v33 }
 0x58d   : > { %v1778_v48 = vsel %vm237_vm0, %v1777_v44, %v1694_v40 }
 0x58e   : > { %v1782_v51 = vperm.slane %v1778_v48, %v3843_v11 }
 0x590   : > { %v1803_v62 = vrot.slane %v1782_v51, 4 }
 0x591   : > { %v1707_v52 = vpop.permute.xlu1 %1706 }
 0x592   : > { %v1783_v55 = vrot.slane %v1707_v52, 4 }
 0x593   : > { %1865 = vrot.lane.b32.xlu1 %v1764_v43, %s3723_s14 }
 0x594   : > { %v1784_v59 = vsel %vm237_vm0, %v1783_v55, %v1697_v56 }
 0x595   : > { %v1788_v63 = vperm.slane %v1784_v59, %v3843_v11 }
 0x597   : > { %v1801_v2 = vrot.slane %v1788_v63, 4  ;;  %v1804_v3 = vsel %vm237_vm0, %v1788_v63, %v1803_v62 }
 0x598   : > { %v1812_v5 = vperm.slane %v1804_v3, %v3853_v24 }
 0x599   : > { %v1802_v13 = vsel %vm237_vm0, %v1801_v2, %v1782_v51 }
 0x59a   : > { %v1820_v12 = vsel %vm237_vm0, %v1812_v5, %v1819_v7  ;;  %v1808_v17 = vperm.slane %v1802_v13, %v3853_v24  ;;  %v1817_v23 = vrot.slane %v1812_v5, 4 }
 0x59b   : > { %1881 = vrot.lane.b32.xlu1 %v1760_v9, %s3724_s20  ;;  %1867 = vrot.lane.b32.xlu0 %v1820_v12, %s3723_s14 }
 0x59c   : > { %1843 = vrot.lane.b32.xlu2 %v1820_v12, %s3722_s13  ;;  %v1816_v20 = vsel %vm237_vm0, %v1808_v17, %v1815_v18  ;;  %v1818_v25 = vsel %vm237_vm0, %v1817_v23, %v1800_v61  ;;  %v1813_v27 = vrot.slane %v1808_v17, 4 }
 0x59e   : > { %v1814_v28 = vsel %vm237_vm0, %v1813_v27, %v1796_v15 }
 0x5a3   : > { %1837 = vrot.lane.b32.xlu0 %v1762_v19, %s3722_s13  ;;  %1883 = vrot.lane.b32.xlu1 %v1816_v20, %s3724_s20 }
 0x5a4   : > { %1833 = vrot.lane.b32.xlu2 %v1760_v9, %s3722_s13 }
 0x5ab   : > { %1861 = vrot.lane.b32.xlu0 %v1762_v19, %s3723_s14  ;;  %1853 = vrot.lane.b32.xlu1 %v1758_v22, %s3723_s14 }
 0x5ac   : > { %1857 = vrot.lane.b32.xlu2 %v1760_v9, %s3723_s14 }
 0x5b3   : > { %1877 = vrot.lane.b32.xlu1 %v1758_v22, %s3724_s20  ;;  %1835 = vrot.lane.b32.xlu0 %v1816_v20, %s3722_s13 }
 0x5b4   : > { %1891 = vrot.lane.b32.xlu2 %v1820_v12, %s3724_s20 }
 0x5bb   : > { %1839 = vrot.lane.b32.xlu1 %v1818_v25, %s3722_s13  ;;  %1889 = vrot.lane.b32.xlu0 %v1764_v43, %s3724_s20 }
 0x5bc   : > { %1859 = vrot.lane.b32.xlu2 %v1816_v20, %s3723_s14 }
 0x5c3   : > { %1829 = vrot.lane.b32.xlu0 %v1758_v22, %s3722_s13  ;;  %1855 = vrot.lane.b32.xlu1 %v1814_v28, %s3723_s14 }
 0x5c4   : > { %1885 = vrot.lane.b32.xlu2 %v1762_v19, %s3724_s20 }
 0x5cb   : > { %1863 = vrot.lane.b32.xlu0 %v1818_v25, %s3723_s14  ;;  %s4842_s14 = smov 16  }
 0x5cc   : > { %1887 = vrot.lane.b32.xlu2 %v1818_v25, %s3724_s20 }
 0x5d3   : > { %1831 = vrot.lane.b32.xlu0 %v1814_v28, %s3722_s13 }
 0x5d4   : > { %1879 = vrot.lane.b32.xlu2 %v1814_v28, %s3724_s20  ;;  %s4843_s20 = smov 126  }
 0x5f6   : > { %v1844_v31 = vpop.permute.xlu2 %1843 }
 0x5fd   : > { %v1842_v32 = vpop.permute.xlu1 %1841 }
 0x5fe   : > { %v1834_v33 = vpop.permute.xlu2 %1833 }
 0x605   : > { %v1866_v30 = vpop.permute.xlu1 %1865 }
 0x606   : > { %v1858_v29 = vpop.permute.xlu2 %1857  ;;  %v1907_v43 = vsel %vm530_vm1, %v1842_v32, %v1866_v30 }
 0x607   : > { %v1903_v45 = vsel %vm530_vm1, %v1834_v33, %v1858_v29 }
 0x60d   : > { %v1868_v26 = vpop.permute.xlu0 %1867  ;;  %v1882_v34 = vpop.permute.xlu1 %1881 }
 0x60e   : > { %v1892_v36 = vpop.permute.xlu2 %1891  ;;  %v1911_v46 = vsel %vm539_vm2, %v1903_v45, %v1882_v34  ;;  %v1908_v2 = vsel %vm530_vm1, %v1844_v31, %v1868_v26 }
 0x60f   : > { %v1931_v51 = vrot.slane %v1911_v46, 4  ;;  %v1916_v16 = vsel %vm539_vm2, %v1908_v2, %v1892_v36 }
 0x610   : > { %v1985_v25 = vrot.slane %v1916_v16, 4 }
 0x615   : > { %v1838_v35 = vpop.permute.xlu0 %1837  ;;  %v1884_v37 = vpop.permute.xlu1 %1883 }
 0x616   : > { %v1860_v41 = vpop.permute.xlu2 %1859 }
 0x61d   : > { %v1862_v38 = vpop.permute.xlu0 %1861  ;;  %v1854_v42 = vpop.permute.xlu1 %1853 }
 0x61e   : > { %v1905_v48 = vsel %vm530_vm1, %v1838_v35, %v1862_v38  ;;  %v1886_v49 = vpop.permute.xlu2 %1885 }
 0x61f   : > { %v1913_v52 = vsel %vm539_vm2, %v1905_v48, %v1886_v49 }
 0x620   : > { %v1917_v56 = vrot.slane %v1913_v52, 4 }
 0x625   : > { %v1836_v39 = vpop.permute.xlu0 %1835  ;;  %v1878_v50 = vpop.permute.xlu1 %1877 }
 0x626   : > { %v1904_v0 = vsel %vm530_vm1, %v1836_v39, %v1860_v41  ;;  %v1888_v12 = vpop.permute.xlu2 %1887 }
 0x627   : > { %v1912_v13 = vsel %vm539_vm2, %v1904_v0, %v1884_v37 }
 0x628   : > { %v1987_v22 = vrot.slane %v1912_v13, 4  ;;  %v1986_v31 = vsel %vm237_vm0, %v1985_v25, %v1912_v13 }
 0x629   : > { %v1992_v29 = vperm.slane %v1986_v31, %v3843_v11 }
 0x62a   : > { %v1988_v32 = vsel %vm237_vm0, %v1916_v16, %v1987_v22 }
 0x62b   : > { %v1996_v36 = vperm.slane %v1988_v32, %v3843_v11 }
 0x62d   : > { %v1890_v44 = vpop.permute.xlu0 %1889  ;;  %v1840_v7 = vpop.permute.xlu1 %1839  ;;  %v2009_v48 = vrot.slane %v1996_v36, 4 }
 0x62e   : > { %v1915_v40 = vsel %vm539_vm2, %v1907_v43, %v1890_v44  ;;  %v1880_v37 = vpop.permute.xlu2 %1879 }
 0x62f   : > { %v1929_v47 = vrot.slane %v1915_v40, 4  ;;  %v1932_v54 = vsel %vm237_vm0, %v1915_v40, %v1931_v51  ;;  %v1997_v40 = vrot.slane %v1992_v29, 4 }
 0x630   : > { %v1940_v60 = vperm.slane %v1932_v54, %v3843_v11 }
 0x631   : > { %v1930_v53 = vsel %vm237_vm0, %v1929_v47, %v1911_v46 }
 0x632   : > { %v1936_v58 = vperm.slane %v1930_v53, %v3843_v11  ;;  %v1953_v5 = vrot.slane %v1940_v60, 4 }
 0x634   : > { %v1941_v3 = vrot.slane %v1936_v58, 4 }
 0x635   : > { %v1830_v55 = vpop.permute.xlu0 %1829  ;;  %v1856_v34 = vpop.permute.xlu1 %1855 }
 0x636   : > { %v1901_v59 = vsel %vm530_vm1, %v1830_v55, %v1854_v42 }
 0x637   : > { %v1909_v61 = vsel %vm539_vm2, %v1901_v59, %v1878_v50 }
 0x638   : > { %v1918_v62 = vsel %vm237_vm0, %v1917_v56, %v1909_v61  ;;  %v1919_v63 = vrot.slane %v1909_v61, 4 }
 0x639   : > { %v1924_v1 = vperm.slane %v1918_v62, %v3843_v11 }
 0x63a   : > { %v1920_v4 = vsel %vm237_vm0, %v1913_v52, %v1919_v63 }
 0x63b   : > { %v1943_v8 = vrot.slane %v1924_v1, 4  ;;  %v1928_v9 = vperm.slane %v1920_v4, %v3843_v11  ;;  %v1942_v15 = vsel %vm237_vm0, %v1941_v3, %v1924_v1 }
 0x63c   : > { %v4382_v23 = vperm.slane %v1942_v15, %v3853_v24 }
 0x63d   : > { %v1864_v17 = vpop.permute.xlu0 %1863  ;;  %v1954_v18 = vsel %vm237_vm0, %v1953_v5, %v1928_v9  ;;  %v1944_v19 = vsel %vm237_vm0, %v1936_v58, %v1943_v8  ;;  %v1955_v28 = vrot.slane %v1928_v9, 4 }
 0x63e   : > { %v1960_v20 = vperm.slane %v1954_v18, %v3853_v24  ;;  %v1952_v21 = vperm.slane %v1944_v19, %v3853_v24  ;;  %v1906_v27 = vsel %vm530_vm1, %v1840_v7, %v1864_v17  ;;  %v1965_v30 = vrot.slane %v4382_v23, 4 }
 0x63f   : > { %v1914_v33 = vsel %vm539_vm2, %v1906_v27, %v1888_v12  ;;  %v1956_v26 = vsel %vm237_vm0, %v1940_v60, %v1955_v28 }
 0x640   : > { %2042 = vrot.lane.b32.xlu0 %v1960_v20, %s3725_s22  ;;  %2034 = vrot.lane.b32.xlu2 %v1952_v21, %s3726_s23  ;;  %v1973_v38 = vrot.slane %v1914_v33, 4  ;;  %v1966_v42 = vsel %vm237_vm0, 0.0, %v1965_v30  ;;  %v1964_v43 = vperm.slane %v1956_v26, %v3853_v24  ;;  %s4844_s22 = smov 88   ;;  %s4845_s23 = smov 52   ;;  %v1967_v1 = vrot.slane %v1952_v21, 4 }
 0x641   : > { %v1969_v3 = vrot.slane %v1960_v20, 4 }
 0x642   : > { %v1971_v51 = vrot.slane %v1964_v43, 4  ;;  %v1968_v4 = vsel %vm237_vm0, 0.0, %v1967_v1 }
 0x643   : > { %v1970_v7 = vsel %vm237_vm0, 0.0, %v1969_v3 }
 0x644   : > { %v1972_v58 = vsel %vm237_vm0, 0.0, %v1971_v51 }
 0x645   : > { %v1832_v35 = vpop.permute.xlu0 %1831 }
 0x646   : > { %v1902_v39 = vsel %vm530_vm1, %v1832_v35, %v1856_v34  ;;  %vm4854_vm1 = vcmask 424960  }
 0x647   : > { %v1910_v41 = vsel %vm539_vm2, %v1902_v39, %v1880_v37  ;;  %vm4855_vm2 = vcmask 113664  }
 0x648   : > { %v1974_v44 = vsel %vm237_vm0, %v1973_v38, %v1910_v41  ;;  %v1975_v45 = vrot.slane %v1910_v41, 4  ;;  %2030 = vrot.lane.b32.xlu0 %v1966_v42, %s3732_s6 }
 0x649   : > { %v1980_v46 = vperm.slane %v1974_v44, %v3843_v11 }
 0x64a   : > { %v1976_v47 = vsel %vm237_vm0, %v1914_v33, %v1975_v45 }
 0x64b   : > { %v1999_v49 = vrot.slane %v1980_v46, 4  ;;  %v1998_v50 = vsel %vm237_vm0, %v1997_v40, %v1980_v46  ;;  %v1984_v52 = vperm.slane %v1976_v47, %v3843_v11 }
 0x64c   : > { %v2004_v53 = vperm.slane %v1998_v50, %v3853_v24 }
 0x64d   : > { %v2010_v54 = vsel %vm237_vm0, %v2009_v48, %v1984_v52  ;;  %v2000_v55 = vsel %vm237_vm0, %v1992_v29, %v1999_v49  ;;  %v2011_v0 = vrot.slane %v1984_v52, 4 }
 0x64e   : > { %2058 = vrot.lane.b32.xlu1 %v2004_v53, %s4842_s14  ;;  %v2016_v56 = vperm.slane %v2010_v54, %v3853_v24  ;;  %v2008_v59 = vperm.slane %v2000_v55, %v3853_v24  ;;  %v2021_v61 = vrot.slane %v2004_v53, 4 }
 0x64f   : > { %v2012_v2 = vsel %vm237_vm0, %v1996_v36, %v2011_v0 }
 0x650   : > { %2054 = vrot.lane.b32.xlu0 %v1972_v58, %s4843_s20  ;;  %2074 = vrot.lane.b32.xlu2 %v2016_v56, %s4844_s22  ;;  %v2023_v60 = vrot.slane %v2008_v59, 4  ;;  %v2022_v63 = vsel %vm237_vm0, 0.0, %v2021_v61  ;;  %s4848_s22 = smov 54   ;;  %v2020_v5 = vperm.slane %v2012_v2, %v3853_v24  ;;  %v2025_v8 = vrot.slane %v2016_v56, 4 }
 0x652   : > { %v2024_v62 = vsel %vm237_vm0, 0.0, %v2023_v60  ;;  %v2027_v9 = vrot.slane %v2020_v5, 4  ;;  %v2026_v12 = vsel %vm237_vm0, 0.0, %v2025_v8 }
 0x654   : > { %v2028_v13 = vsel %vm237_vm0, 0.0, %v2027_v9 }
 0x656   : > { %2066 = vrot.lane.b32.xlu1 %v2008_v59, %s4845_s23  ;;  %s4849_s23 = smov 124  }
 0x658   : > { %2070 = vrot.lane.b32.xlu0 %v2024_v62, %s4846_s10  ;;  %2062 = vrot.lane.b32.xlu2 %v2022_v63, %s4847_s28  ;;  %s4851_s10 = smov 106   ;;  %s4852_s28 = smov 14  }
 0x65e   : > { %2038 = vrot.lane.b32.xlu1 %v1968_v4, %s4848_s22 }
 0x660   : > { %2082 = vrot.lane.b32.xlu0 %v2020_v5, %s4849_s23  ;;  %2046 = vrot.lane.b32.xlu2 %v1970_v7, %s4850_s7  ;;  %s4863_s23 = smov 110  }
 0x666   : > { %2078 = vrot.lane.b32.xlu1 %v2026_v12, %s4851_s10  ;;  %s4884_s10 = smov 114  }
 0x668   : > { %2086 = vrot.lane.b32.xlu2 %v2028_v13, %s4852_s28  ;;  %s4888_s28 = smov 94  }
 0x66e   : > { %2050 = vrot.lane.b32.xlu1 %v1964_v43, %s4853_s11 }
 0x69a   : > { %v2035_v15 = vpop.permute.xlu2 %2034 }
 0x6aa   : > { %v2075_v17 = vpop.permute.xlu2 %2074 }
 0x6b2   : > { %v2043_v16 = vpop.permute.xlu0 %2042  ;;  %v2063_v20 = vpop.permute.xlu2 %2062 }
 0x6ba   : > { %v2031_v18 = vpop.permute.xlu0 %2030  ;;  %v2047_v27 = vpop.permute.xlu2 %2046 }
 0x6bb   : > { %v2089_v34 = vsel %vm720_vm3, %v4382_v23, %v2031_v18 }
 0x6bc   : > { %v2090_v38 = vsel %vm4857_vm14, %v2089_v34, %v2035_v15  ;;  %vm4862_vm14 = vcmask 1031168  }
 0x6c0   : > { %v2059_v19 = vpop.permute.xlu1 %2058 }
 0x6c2   : > { %v2055_v21 = vpop.permute.xlu0 %2054  ;;  %v2087_v26 = vpop.permute.xlu2 %2086 }
 0x6c3   : > { %v2096_v28 = vsel %vm4837_vm7, %v2055_v21, %v2059_v19  ;;  %vm4858_vm7 = vcmask 867328  }
 0x6c4   : > { %v2097_v32 = vsel %vm736_vm8, %v2096_v28, %v2063_v20  ;;  %vm4859_vm8 = vcmask 1014784  }
 0x6c8   : > { %v2067_v22 = vpop.permute.xlu1 %2066 }
 0x6c9   : > { %v2098_v33 = vsel %vm4854_vm1, %v2097_v32, %v2067_v22  ;;  %vm4861_vm1 = vcmask 883712  }
 0x6ca   : > { %v2071_v25 = vpop.permute.xlu0 %2070 }
 0x6cb   : > { %v2099_v29 = vsel %vm740_vm11, %v2098_v33, %v2071_v25  ;;  %vm4860_vm11 = vcmask 588800  }
 0x6cc   : > { %v2100_v37 = vsel %vm4856_vm15, %v2099_v29, %v2075_v17  ;;  %vm4866_vm15 = vcmask 552336  }
 0x6d0   : > { %v2039_v31 = vpop.permute.xlu1 %2038 }
 0x6d1   : > { %v2091_v42 = vsel %vm724_vm5, %v2090_v38, %v2039_v31 }
 0x6d2   : > { %v2083_v30 = vpop.permute.xlu0 %2082  ;;  %v2092_v23 = vsel %vm4860_vm11, %v2091_v42, %v2043_v16  ;;  %v3494_v42 = vld [vmem:[%s4774_s2 + $0x4] sm:$0xf]  ;;  %vm4873_vm11 = vcmask 900096  }
 0x6d3   : > { %v2103_v35 = vsel %vm4855_vm2, %v2083_v30, %v2087_v26  ;;  %v2093_v40 = vsel %vm728_vm10, %v2092_v23, %v2047_v27  ;;  %vm4865_vm2 = vcmask 404480  }
 0x6d4   : > { %v2124_v39 = vrot.slane %v2103_v35, 4 }
 0x6d8   : > { %v2079_v36 = vpop.permute.xlu1 %2078 }
 0x6d9   : > { %v2101_v41 = vsel %vm4858_vm7, %v2100_v37, %v2079_v36  ;;  %vm4864_vm7 = vcmask 142336   ;;  %v2134_v37 = vld [vmem:[%s4774_s2] sm:$0xf] }
 0x6da   : > { %v2102_v43 = vsel %vm4859_vm8, %v2101_v41, %v2083_v30 }
 0x6db   : > { %v2125_v44 = vsel %vm754_vm4, %v2102_v43, %v2124_v39  ;;  %v2107_v46 = vrot.slane %v2102_v43, 4 }
 0x6dc   : > { %2126 = vrot.lane.b32.xlu2 %v2125_v44, %s4848_s22  ;;  %s4883_s22 = smov 58  }
 0x6e0   : > { %v2051_v45 = vpop.permute.xlu1 %2050 }
 0x6e1   : > { %v2094_v47 = vsel %vm4861_vm1, %v2093_v40, %v2051_v45  ;;  %vm4874_vm1 = vmmov %vm4873_vm11 }
 0x6e2   : > { %v2095_v48 = vsel %vm4862_vm14, %v2094_v47, %v2055_v21 }
 0x6e3   : > { %2120 = vrot.lane.b32.xlu1 %v2095_v48, %s4863_s23  ;;  %v2108_v49 = vsel %vm754_vm4, %v2095_v48, %v2107_v46  ;;  %v3507_v46 = vld [vmem:[%s4774_s2 + $0x8] sm:$0xf] }
 0x6e4   : > { %2109 = vrot.lane.b32.xlu0 %v2108_v49, %s3732_s6 }
 0x6ec   : > { %2111 = vrot.lane.b32.xlu0 %v2103_v35, %s3732_s6  ;;  %s4867_s6 = smov 109  }
 0x736   : > { %v2127_v52 = vpop.permute.xlu2 %2126 }
 0x737   : > { %v2128_v55 = vrot.slane %v2127_v52, 4 }
 0x739   : > { %v2129_v59 = vsel %vm724_vm5, %v2127_v52, %v2128_v55  ;;  %v3514_v52 = vld [vmem:[%s4774_s2 + $0xc] sm:$0xf] }
 0x755   : > { %v2121_v54 = vpop.permute.xlu1 %2120 }
 0x756   : > { %v2110_v50 = vpop.permute.xlu0 %2109 }
 0x757   : > { %v2113_v51 = vrot.slane %v2110_v50, 4 }
 0x759   : > { %v2114_v53 = vsel %vm720_vm3, %v2113_v51, %v2110_v50 }
 0x75a   : > { %2118 = vst.msk [vmem:[#allocation2] sm:$0xff] %vm4101_vm13, %v2114_v53  ;;  %vm4871_vm13 = vmmov %vm4862_vm14  ;;  %vm4875_vm14 = vcmask 891904  }
 0x75b   : > { %2123 = vst.msk [vmem:[#allocation2] sm:$0xf] %vm4864_vm7, %v2121_v54  ;;  %vm4872_vm8 = vmmov %vm4871_vm13 }
 0x75c   : > { %vm4876_vm7 = vmmov %vm4875_vm14 }
 0x75e   : > { %v2112_v56 = vpop.permute.xlu0 %2111 }
 0x75f   : > { %v2115_v58 = vsel %vm720_vm3, %v2113_v51, %v2112_v56  ;;  %vm4869_vm3 = vcmask 1039360  }
 0x760   : > { %2119 = vst.msk [vmem:[#allocation2 + $0x8] sm:$0xf] %vm4865_vm2, %v2115_v58  ;;  %vm4870_vm5 = vmmov %vm4869_vm3  ;;  %v3521_v58 = vld [vmem:[%s4774_s2 + $0x10] sm:$0xf]  ;;  %vm4877_vm2 = vcmask 883712  }
 0x761   : > { %2131 = vst.msk [vmem:[#allocation2 + $0x8] sm:$0xf] %vm4866_vm15, %v2129_v59  ;;  %vm4878_vm15 = vmmov %vm4877_vm2 }
 0x762   : > { %v4460_v60 = vld [vmem:[#allocation2] sm:$0xff] }
 0x763   : > { %2139 = vst [vmem:[#allocation1] ss:$2 sm:$0xff] %v4460_v60 }
 0x768   : > { %v2133_v61 = vld [vmem:[#allocation2 + $0x8] sm:$0xf] }
 0x769   : > { %2141 = vst [vmem:[#allocation1 + $0x10] ss:$2 sm:$0xff] %v2133_v61  ;;  %v2298_v2 = vld [vmem:[#allocation2 + $0x8] sm:$0xf] }
 0x76a   : > { %v2142_v57 = vld.sshfl [vmem:[#allocation1] sm:$0xff pattern:$0x75316420]  ;;  %v2143_v62 = vld.sshfl [vmem:[#allocation1 + $0x8] sm:$0xff pattern:$0x75316420] }
 0x76b   : > { %2145 = vrot.lane.b32.xlu1 %v2142_v57, %s3722_s13  ;;  %2222 = vst [vmem:[#allocation1] ss:$2 sm:$0xff] %v4460_v60  ;;  %2147 = vrot.lane.b32.xlu2 %v2143_v62, %s3722_s13  ;;  %v2390_v7 = vld [vmem:[#allocation2 + $0x8] sm:$0xf] }
 0x76c   : > { %v2482_v13 = vld [vmem:[#allocation2 + $0x8] sm:$0xf] }
 0x76d   : > { %v2574_v18 = vld [vmem:[#allocation2 + $0x8] sm:$0xf] }
 0x76e   : > { %v2666_v22 = vld [vmem:[#allocation2 + $0x8] sm:$0xf] }
 0x76f   : > { %v2758_v31 = vld [vmem:[#allocation2 + $0x8] sm:$0xf] }
 0x770   : > { %v2144_v63 = vld.sshfl [vmem:[#allocation1 + $0x10] sm:$0xff pattern:$0x75316420] }
 0x771   : > { %2149 = vrot.lane.b32.xlu0 %v2144_v63, %s3722_s13  ;;  %2224 = vst [vmem:[#allocation1 + $0x10] ss:$2 sm:$0xff] %v2133_v61  ;;  %s4868_s13 = smov 91   ;;  %v2850_v26 = vld [vmem:[#allocation2 + $0x8] sm:$0xf] }
 0x772   : > { %v4467_v0 = vld.sshfl [vmem:[#allocation1 + $0x8] sm:$0xff pattern:$0x75316420]  ;;  %v2225_v1 = vld.sshfl [vmem:[#allocation1] sm:$0xff pattern:$0x75316420] }
 0x773   : > { %3501 = vmatpush.msk.msrb.mxu2 %vm754_vm4, %v2225_v1  ;;  %2303 = vst [vmem:[#allocation1] ss:$2 sm:$0xff] %v4460_v60  ;;  %v3528_v63 = vld [vmem:[%s4774_s2 + $0x14] sm:$0xf] }
 0x774   : > { %3502 = vmatmul.msk.f32.vlgmr.msrb.gmra.mxu2 %vm806_vm9, %v2134_v37 }
 0x778   : > { %v4471_v3 = vld.sshfl [vmem:[#allocation1 + $0x10] sm:$0xff pattern:$0x75316420] }
 0x779   : > { %2305 = vst [vmem:[#allocation1 + $0x10] ss:$2 sm:$0xff] %v2298_v2 }
 0x77a   : > { %v2306_v4 = vld.sshfl [vmem:[#allocation1] sm:$0xff pattern:$0x75316420]  ;;  %v2307_v5 = vld.sshfl [vmem:[#allocation1 + $0x8] sm:$0xff pattern:$0x75316420] }
 0x77b   : > { %2309 = vrot.lane.b32.xlu1 %v2306_v4, %s4843_s20  ;;  %2311 = vrot.lane.b32.xlu2 %v2307_v5, %s4843_s20  ;;  %2395 = vst [vmem:[#allocation1] ss:$2 sm:$0xff] %v4460_v60  ;;  %v3535_v5 = vld [vmem:[%s4774_s2 + $0x18] sm:$0xf] }
 0x780   : > { %v2308_v8 = vld.sshfl [vmem:[#allocation1 + $0x10] sm:$0xff pattern:$0x75316420] }
 0x781   : > { %2313 = vrot.lane.b32.xlu0 %v2308_v8, %s4843_s20  ;;  %2397 = vst [vmem:[#allocation1 + $0x10] ss:$2 sm:$0xff] %v2390_v7  ;;  %s3562_s20 = sshll.u32 %s3801_s19, 3 }
 0x782   : > { %v2398_v9 = vld.sshfl [vmem:[#allocation1] sm:$0xff pattern:$0x75316420]  ;;  %v2399_v12 = vld.sshfl [vmem:[#allocation1 + $0x8] sm:$0xff pattern:$0x75316420] }
 0x783   : > { %2401 = vrot.lane.b32.xlu1 %v2398_v9, %s4863_s23  ;;  %2403 = vrot.lane.b32.xlu2 %v2399_v12, %s4863_s23  ;;  %2487 = vst [vmem:[#allocation1] ss:$2 sm:$0xff] %v4460_v60 }
 0x788   : > { %v2400_v15 = vld.sshfl [vmem:[#allocation1 + $0x10] sm:$0xff pattern:$0x75316420] }
 0x789   : > { %2405 = vrot.lane.b32.xlu0 %v2400_v15, %s4863_s23  ;;  %2489 = vst [vmem:[#allocation1 + $0x10] ss:$2 sm:$0xff] %v2482_v13  ;;  %v3542_v15 = vld [vmem:[%s4774_s2 + $0x1c] sm:$0xf] }
 0x78a   : > { %v2490_v16 = vld.sshfl [vmem:[#allocation1] sm:$0xff pattern:$0x75316420]  ;;  %v2491_v17 = vld.sshfl [vmem:[#allocation1 + $0x8] sm:$0xff pattern:$0x75316420] }
 0x78b   : > { %2493 = vrot.lane.b32.xlu1 %v2490_v16, %s4867_s6  ;;  %2495 = vrot.lane.b32.xlu2 %v2491_v17, %s4867_s6  ;;  %2579 = vst [vmem:[#allocation1] ss:$2 sm:$0xff] %v4460_v60 }
 0x790   : > { %v2492_v19 = vld.sshfl [vmem:[#allocation1 + $0x10] sm:$0xff pattern:$0x75316420] }
 0x791   : > { %2497 = vrot.lane.b32.xlu0 %v2492_v19, %s4867_s6  ;;  %2581 = vst [vmem:[#allocation1 + $0x10] ss:$2 sm:$0xff] %v2574_v18  ;;  %s4889_s6 = smov 40  }
 0x792   : > { %v2582_v20 = vld.sshfl [vmem:[#allocation1] sm:$0xff pattern:$0x75316420]  ;;  %v2583_v21 = vld.sshfl [vmem:[#allocation1 + $0x8] sm:$0xff pattern:$0x75316420] }
 0x793   : > { %2585 = vrot.lane.b32.xlu1 %v2582_v20, %s4853_s11  ;;  %2587 = vrot.lane.b32.xlu2 %v2583_v21, %s4853_s11  ;;  %2671 = vst [vmem:[#allocation1] ss:$2 sm:$0xff] %v4460_v60  ;;  %v3549_v21 = vld [vmem:[%s4774_s2 + $0x20] sm:$0xf] }
 0x798   : > { %v2584_v25 = vld.sshfl [vmem:[#allocation1 + $0x10] sm:$0xff pattern:$0x75316420] }
 0x799   : > { %2589 = vrot.lane.b32.xlu0 %v2584_v25, %s4853_s11  ;;  %2673 = vst [vmem:[#allocation1 + $0x10] ss:$2 sm:$0xff] %v2666_v22 }
 0x79a   : > { %v2674_v27 = vld.sshfl [vmem:[#allocation1] sm:$0xff pattern:$0x75316420]  ;;  %v2675_v28 = vld.sshfl [vmem:[#allocation1 + $0x8] sm:$0xff pattern:$0x75316420] }
 0x79b   : > { %2677 = vrot.lane.b32.xlu1 %v2674_v27, %s3741_s12  ;;  %2679 = vrot.lane.b32.xlu2 %v2675_v28, %s3741_s12  ;;  %2763 = vst [vmem:[#allocation1] ss:$2 sm:$0xff] %v4460_v60 }
 0x7a0   : > { %v2676_v32 = vld.sshfl [vmem:[#allocation1 + $0x10] sm:$0xff pattern:$0x75316420] }
 0x7a1   : > { %2681 = vrot.lane.b32.xlu0 %v2676_v32, %s3741_s12  ;;  %2765 = vst [vmem:[#allocation1 + $0x10] ss:$2 sm:$0xff] %v2758_v31 }
 0x7a2   : > { %v2766_v33 = vld.sshfl [vmem:[#allocation1] sm:$0xff pattern:$0x75316420]  ;;  %v2767_v30 = vld.sshfl [vmem:[#allocation1 + $0x8] sm:$0xff pattern:$0x75316420] }
 0x7a3   : > { %2769 = vrot.lane.b32.xlu1 %v2766_v33, %s4868_s13  ;;  %2771 = vrot.lane.b32.xlu2 %v2767_v30, %s4868_s13  ;;  %2855 = vst [vmem:[#allocation1] ss:$2 sm:$0xff] %v4460_v60 }
 0x7a8   : > { %v2768_v29 = vld.sshfl [vmem:[#allocation1 + $0x10] sm:$0xff pattern:$0x75316420] }
 0x7a9   : > { %2773 = vrot.lane.b32.xlu0 %v2768_v29, %s4868_s13  ;;  %2857 = vst [vmem:[#allocation1 + $0x10] ss:$2 sm:$0xff] %v2850_v26  ;;  %s4896_s13 = smov 48  }
 0x7aa   : > { %v2858_v34 = vld.sshfl [vmem:[#allocation1] sm:$0xff pattern:$0x75316420]  ;;  %v2859_v35 = vld.sshfl [vmem:[#allocation1 + $0x8] sm:$0xff pattern:$0x75316420] }
 0x7ab   : > { %2861 = vrot.lane.b32.xlu1 %v2858_v34, %s4850_s7  ;;  %2863 = vrot.lane.b32.xlu2 %v2859_v35, %s4850_s7 }
 0x7b0   : > { %v2860_v36 = vld.sshfl [vmem:[#allocation1 + $0x10] sm:$0xff pattern:$0x75316420] }
 0x7b1   : > { %2865 = vrot.lane.b32.xlu0 %v2860_v36, %s4850_s7  ;;  %s4885_s7 = smov 112  }
 0x7c5   : > { %v2148_v38 = vpop.permute.xlu2 %2147 }
 0x7d5   : > { %v2312_v43 = vpop.permute.xlu2 %2311 }
 0x7dd   : > { %v2146_v39 = vpop.permute.xlu1 %2145  ;;  %v2404_v45 = vpop.permute.xlu2 %2403 }
 0x7de   : > { %v2151_v41 = vsel %vm4869_vm3, %v2146_v39, %v2148_v38  ;;  %vm4879_vm3 = vcmask 752640  }
 0x7df   : > { %3495 = vmatpush.msk.msra.mxu3 %vm754_vm4, %v2151_v41 }
 0x7e0   : > { %3496 = vmatmul.msk.f32.vlgmr.msra.gmra.mxu3 %vm806_vm9, %v3494_v42 }
 0x7e1   : > { %3503 = vmatpush.msk.msrb.mxu3 %vm754_vm4, %v4467_v0 }
 0x7e3   : > { %v2150_v44 = vpop.permute.xlu0 %2149 }
 0x7e4   : > { %v2152_v23 = vsel %vm4870_vm5, %v2148_v38, %v2150_v44  ;;  %3499 = vmatpush.msk.msrb.mxu1 %vm754_vm4, %v2150_v44  ;;  %vm4880_vm5 = vmmov %vm4879_vm3 }
 0x7e5   : > { %3497 = vmatpush.msk.msrb.mxu0 %vm754_vm4, %v2152_v23  ;;  %3500 = vmatmul.msk.f32.vlgmr.msrb.gmra.mxu1 %vm806_vm9, %v3494_v42  ;;  %v2496_v50 = vpop.permute.xlu2 %2495 }
 0x7e6   : > { %3498 = vmatmul.msk.f32.vlgmr.msrb.gmra.mxu0 %vm806_vm9, %v3494_v42 }
 0x7e7   : > { %3505 = vmatpush.msk.msra.mxu0 %vm754_vm4, %v4471_v3 }
 0x7e8   : > { %3504 = vmatmul.msk.f32.vlgmr.msrb.gmra.mxu3 %vm806_vm9, %v2134_v37 }
 0x7ed   : > { %v2310_v40 = vpop.permute.xlu1 %2309  ;;  %v2588_v60 = vpop.permute.xlu2 %2587 }
 0x7ee   : > { %v2315_v47 = vsel %vm4871_vm13, %v2310_v40, %v2312_v43  ;;  %3506 = vmatmul.msk.f32.vlgmr.msra.gmra.mxu0 %vm806_vm9, %v2134_v37  ;;  %vm4881_vm13 = vcmask 744448  }
 0x7ef   : > { %3508 = vmatpush.msk.msra.mxu1 %vm754_vm4, %v2315_v47 }
 0x7f0   : > { %3509 = vmatmul.msk.f32.vlgmr.msra.gmra.mxu1 %vm806_vm9, %v3507_v46 }
 0x7f3   : > { %v2314_v48 = vpop.permute.xlu0 %2313 }
 0x7f4   : > { %v2316_v49 = vsel %vm4872_vm8, %v2312_v43, %v2314_v48  ;;  %3512 = vmatpush.msk.msra.mxu3 %vm754_vm4, %v2314_v48  ;;  %vm4882_vm8 = vmmov %vm4881_vm13 }
 0x7f5   : > { %v2402_v51 = vpop.permute.xlu1 %2401  ;;  %3510 = vmatpush.msk.msra.mxu2 %vm754_vm4, %v2316_v49  ;;  %3513 = vmatmul.msk.f32.vlgmr.msra.gmra.mxu3 %vm806_vm9, %v3507_v46  ;;  %v2680_v1 = vpop.permute.xlu2 %2679 }
 0x7f6   : > { %v2407_v53 = vsel %vm4873_vm11, %v2402_v51, %v2404_v45  ;;  %3511 = vmatmul.msk.f32.vlgmr.msra.gmra.mxu2 %vm806_vm9, %v3507_v46 }
 0x7f7   : > { %3515 = vmatpush.msk.msrb.mxu0 %vm754_vm4, %v2407_v53  ;;  %v2254_v33 = vpop.f32.mrf.mxu2 }
 0x7f8   : > { %3516 = vmatmul.msk.f32.vlgmr.msrb.gmra.mxu0 %vm806_vm9, %v3514_v52 }
 0x7fb   : > { %v2406_v54 = vpop.permute.xlu0 %2405 }
 0x7fc   : > { %v2408_v55 = vsel %vm4874_vm1, %v2404_v45, %v2406_v54  ;;  %3519 = vmatpush.msk.msrb.mxu2 %vm754_vm4, %v2406_v54 }
 0x7fd   : > { %v2494_v56 = vpop.permute.xlu1 %2493  ;;  %3517 = vmatpush.msk.msrb.mxu1 %vm754_vm4, %v2408_v55  ;;  %v2772_v8 = vpop.permute.xlu2 %2771 }
 0x7fe   : > { %v2499_v59 = vsel %vm4875_vm14, %v2494_v56, %v2496_v50  ;;  %3518 = vmatmul.msk.f32.vlgmr.msrb.gmra.mxu1 %vm806_vm9, %v3514_v52  ;;  %3520 = vmatmul.msk.f32.vlgmr.msrb.gmra.mxu2 %vm806_vm9, %v3514_v52  ;;  %vm3321_vm14 = vcmask 392192  }
 0x7ff   : > { %3522 = vmatpush.msk.msrb.mxu3 %vm754_vm4, %v2499_v59 }
 0x800   : > { %3523 = vmatmul.msk.f32.vlgmr.msrb.gmra.mxu3 %vm806_vm9, %v3521_v58 }
 0x803   : > { %v2498_v61 = vpop.permute.xlu0 %2497 }
 0x804   : > { %v2500_v57 = vsel %vm4876_vm7, %v2496_v50, %v2498_v61  ;;  %3526 = vmatpush.msk.msra.mxu1 %vm754_vm4, %v2498_v61  ;;  %vm3323_vm7 = vcmask 523264  }
 0x805   : > { %v2586_v62 = vpop.permute.xlu1 %2585  ;;  %3524 = vmatpush.msk.msra.mxu0 %vm754_vm4, %v2500_v57  ;;  %v2864_v19 = vpop.permute.xlu2 %2863 }
 0x806   : > { %v2591_v0 = vsel %vm4877_vm2, %v2586_v62, %v2588_v60  ;;  %3525 = vmatmul.msk.f32.vlgmr.msra.gmra.mxu0 %vm806_vm9, %v3521_v58  ;;  %3527 = vmatmul.msk.f32.vlgmr.msra.gmra.mxu1 %vm806_vm9, %v3521_v58  ;;  %vm3327_vm2 = vcmask 785408  }
 0x807   : > { %3529 = vmatpush.msk.msra.mxu2 %vm754_vm4, %v2591_v0 }
 0x808   : > { %3530 = vmatmul.msk.f32.vlgmr.msra.gmra.mxu2 %vm806_vm9, %v3528_v63 }
 0x80b   : > { %v2590_v2 = vpop.permute.xlu0 %2589 }
 0x80c   : > { %v2592_v3 = vsel %vm4878_vm15, %v2588_v60, %v2590_v2  ;;  %3533 = vmatpush.msk.msrb.mxu0 %vm754_vm4, %v2590_v2  ;;  %vm3325_vm15 = vcmask 654336  }
 0x80d   : > { %v2678_v4 = vpop.permute.xlu1 %2677  ;;  %3531 = vmatpush.msk.msra.mxu3 %vm754_vm4, %v2592_v3 }
 0x80e   : > { %v2683_v7 = vsel %vm4879_vm3, %v2678_v4, %v2680_v1  ;;  %3532 = vmatmul.msk.f32.vlgmr.msra.gmra.mxu3 %vm806_vm9, %v3528_v63  ;;  %3534 = vmatmul.msk.f32.vlgmr.msrb.gmra.mxu0 %vm806_vm9, %v3528_v63  ;;  %vm3329_vm3 = vcmask 916480  }
 0x80f   : > { %3536 = vmatpush.msk.msrb.mxu1 %vm754_vm4, %v2683_v7 }
 0x810   : > { %3537 = vmatmul.msk.f32.vlgmr.msrb.gmra.mxu1 %vm806_vm9, %v3535_v5 }
 0x813   : > { %v2682_v9 = vpop.permute.xlu0 %2681 }
 0x814   : > { %v2684_v12 = vsel %vm4880_vm5, %v2680_v1, %v2682_v9  ;;  %3540 = vmatpush.msk.msrb.mxu3 %vm754_vm4, %v2682_v9 }
 0x815   : > { %v2770_v13 = vpop.permute.xlu1 %2769  ;;  %3538 = vmatpush.msk.msrb.mxu2 %vm754_vm4, %v2684_v12 }
 0x816   : > { %v2775_v16 = vsel %vm4881_vm13, %v2770_v13, %v2772_v8  ;;  %3539 = vmatmul.msk.f32.vlgmr.msrb.gmra.mxu2 %vm806_vm9, %v3535_v5  ;;  %3541 = vmatmul.msk.f32.vlgmr.msrb.gmra.mxu3 %vm806_vm9, %v3535_v5 }
 0x817   : > { %3543 = vmatpush.msk.msra.mxu0 %vm754_vm4, %v2775_v16 }
 0x818   : > { %3544 = vmatmul.msk.f32.vlgmr.msra.gmra.mxu0 %vm806_vm9, %v3542_v15 }
 0x81b   : > { %v2774_v17 = vpop.permute.xlu0 %2773 }
 0x81c   : > { %v2776_v18 = vsel %vm4882_vm8, %v2772_v8, %v2774_v17  ;;  %3547 = vmatpush.msk.msra.mxu2 %vm754_vm4, %v2774_v17 }
 0x81d   : > { %v2862_v20 = vpop.permute.xlu1 %2861  ;;  %3545 = vmatpush.msk.msra.mxu1 %vm754_vm4, %v2776_v18 }
 0x81e   : > { %v2867_v22 = vsel %vm728_vm10, %v2862_v20, %v2864_v19  ;;  %3546 = vmatmul.msk.f32.vlgmr.msra.gmra.mxu1 %vm806_vm9, %v3542_v15  ;;  %3548 = vmatmul.msk.f32.vlgmr.msra.gmra.mxu2 %vm806_vm9, %v3542_v15 }
 0x81f   : > { %3550 = vmatpush.msk.msra.mxu3 %vm754_vm4, %v2867_v22 }
 0x820   : > { %3551 = vmatmul.msk.f32.vlgmr.msra.gmra.mxu3 %vm806_vm9, %v3549_v21 }
 0x823   : > { %v2866_v25 = vpop.permute.xlu0 %2865 }
 0x824   : > { %v2868_v27 = vsel %vm728_vm10, %v2864_v19, %v2866_v25  ;;  %3554 = vmatpush.msk.msrb.mxu1 %vm754_vm4, %v2866_v25 }
 0x825   : > { %3552 = vmatpush.msk.msrb.mxu0 %vm754_vm4, %v2868_v27 }
 0x826   : > { %3553 = vmatmul.msk.f32.vlgmr.msrb.gmra.mxu0 %vm806_vm9, %v3549_v21  ;;  %3555 = vmatmul.msk.f32.vlgmr.msrb.gmra.mxu1 %vm806_vm9, %v3549_v21 }
 0x862   : > { %v2219_v32 = vpop.f32.mrf.mxu1 }
 0x863   : > { %v2199_v28 = vpop.f32.mrf.mxu0  ;;  %v2179_v31 = vpop.f32.mrf.mxu3 }
 0x864   : > { %v2255_v43 = vadd.f32 %v2254_v33, %v2179_v31 }
 0x86b   : > { %v2294_v30 = vpop.f32.mrf.mxu0  ;;  %v2274_v26 = vpop.f32.mrf.mxu3 }
 0x86c   : > { %v2275_v45 = vadd.f32 %v2274_v26, %v2199_v28  ;;  %v2295_v40 = vadd.f32 %v2294_v30, %v2219_v32 }
 0x86d   : > { %v2343_v29 = vpop.f32.mrf.mxu1 }
 0x86e   : > { %v2386_v48 = vadd.f32 %v2343_v29, %v2255_v43 }
 0x875   : > { %v2435_v35 = vpop.f32.mrf.mxu0 }
 0x876   : > { %v2478_v51 = vadd.f32 %v2435_v35, %v2386_v48 }
 0x878   : > { %v2383_v36 = vpop.f32.mrf.mxu3 }
 0x879   : > { %v2363_v34 = vpop.f32.mrf.mxu2  ;;  %v2388_v50 = vadd.f32 %v2383_v36, %v2295_v40 }
 0x87a   : > { %v2387_v49 = vadd.f32 %v2363_v34, %v2275_v45 }
 0x87b   : > { %v2455_v37 = vpop.f32.mrf.mxu1 }
 0x87c   : > { %v2479_v52 = vadd.f32 %v2455_v37, %v2387_v49 }
 0x881   : > { %v2475_v39 = vpop.f32.mrf.mxu2 }
 0x882   : > { %v2480_v53 = vadd.f32 %v2475_v39, %v2388_v50 }
 0x883   : > { %v2547_v38 = vpop.f32.mrf.mxu0  ;;  %v2527_v41 = vpop.f32.mrf.mxu3 }
 0x884   : > { %v2567_v42 = vpop.f32.mrf.mxu1  ;;  %v2570_v55 = vadd.f32 %v2527_v41, %v2478_v51  ;;  %v2571_v56 = vadd.f32 %v2547_v38, %v2479_v52 }
 0x885   : > { %v2572_v61 = vadd.f32 %v2567_v42, %v2480_v53 }
 0x88b   : > { %v2619_v44 = vpop.f32.mrf.mxu2  ;;  %v2659_v46 = vpop.f32.mrf.mxu0 }
 0x88c   : > { %v2662_v57 = vadd.f32 %v2619_v44, %v2570_v55  ;;  %v2664_v63 = vadd.f32 %v2659_v46, %v2572_v61 }
 0x88d   : > { %v2711_v47 = vpop.f32.mrf.mxu1 }
 0x88e   : > { %v2754_v1 = vadd.f32 %v2711_v47, %v2662_v57 }
 0x891   : > { %v2639_v23 = vpop.f32.mrf.mxu3 }
 0x892   : > { %v2663_v62 = vadd.f32 %v2639_v23, %v2571_v56 }
 0x895   : > { %v2803_v58 = vpop.f32.mrf.mxu0 }
 0x896   : > { %v2846_v4 = vadd.f32 %v2803_v58, %v2754_v1 }
 0x899   : > { %v2731_v54 = vpop.f32.mrf.mxu2  ;;  %v2751_v59 = vpop.f32.mrf.mxu3 }
 0x89a   : > { %v2755_v0 = vadd.f32 %v2731_v54, %v2663_v62  ;;  %v2756_v2 = vadd.f32 %v2751_v59, %v2664_v63 }
 0x89b   : > { %v2823_v60 = vpop.f32.mrf.mxu1 }
 0x89c   : > { %v2847_v5 = vadd.f32 %v2823_v60, %v2755_v0 }
 0x8a1   : > { %v2843_v3 = vpop.f32.mrf.mxu2 }
 0x8a2   : > { %v2848_v7 = vadd.f32 %v2843_v3, %v2756_v2 }
 0x8a3   : > { %v2895_v8 = vpop.f32.mrf.mxu3  ;;  %v2915_v9 = vpop.f32.mrf.mxu0 }
 0x8a4   : > { %v2938_v12 = vadd.f32 %v2895_v8, %v2846_v4  ;;  %v2939_v13 = vadd.f32 %v2915_v9, %v2847_v5  ;;  %v2935_v15 = vpop.f32.mrf.mxu1 }
 0x8a5   : > { %v2940_v16 = vadd.f32 %v2935_v15, %v2848_v7 }
 0x8a6   : > { %v2941_v17 = vmul.f32 %v2938_v12, %v4254_v6  ;;  %v2942_v18 = vmul.f32 %v2939_v13, %v4256_v10 }
 0x8a7   : > { %v2943_v19 = vmul.f32 %v2940_v16, %v4258_v14 }
 0x8a8   : > { %v2944_v20 = vsel %vm754_vm4, %v2941_v17, 0.0  ;;  %v2945_v21 = vsel %vm754_vm4, %v2942_v18, 0.0 }
 0x8a9   : > { %v2946_v22 = vadd.f32 %v2945_v21, %v2944_v20  ;;  %v2947_v25 = vsel %vm1612_vm12, %v2943_v19, 0.0 }
 0x8ab   : > { %v2948_v27 = vadd.f32 %v2947_v25, %v2946_v22 }
 0x8ad   : > { %2949 = vadd.xlane.f32.xlu1 %v2948_v27 }
 0x920   : > { %v2950_v28 = vpop.xlane.xlu1 %2949 }
 0x921   : > { %v2951_v31 = vmul.f32 0.00390625, %v2950_v28 }
 0x923   : > { %v2952_v32 = vsub.f32 %v2938_v12, %v2951_v31  ;;  %v2953_v33 = vsub.f32 %v2939_v13, %v2951_v31  ;;  %v2954_v30 = vsub.f32 %v2940_v16, %v2951_v31 }
 0x925   : > { %v2955_v26 = vmul.f32 %v2952_v32, %v2952_v32  ;;  %v2956_v29 = vmul.f32 %v2953_v33, %v2953_v33  ;;  %v2957_v34 = vmul.f32 %v2954_v30, %v2954_v30 }
 0x927   : > { %v2958_v35 = vmul.f32 %v2955_v26, %v4254_v6  ;;  %v2959_v36 = vmul.f32 %v2956_v29, %v4256_v10  ;;  %v2960_v37 = vmul.f32 %v2957_v34, %v4258_v14 }
 0x929   : > { %v2961_v38 = vsel %vm754_vm4, %v2958_v35, 0.0  ;;  %v2962_v39 = vsel %vm754_vm4, %v2959_v36, 0.0  ;;  %v2964_v42 = vsel %vm1612_vm12, %v2960_v37, 0.0  ;;  %vm4891_vm12 = vcmask 15360  }
 0x92a   : > { %v2963_v41 = vadd.f32 %v2962_v39, %v2961_v38 }
 0x92c   : > { %v2965_v43 = vadd.f32 %v2964_v42, %v2963_v41 }
 0x92e   : > { %2966 = vadd.xlane.f32.xlu2 %v2965_v43 }
 0x9a1   : > { %v2967_v44 = vpop.xlane.xlu2 %2966 }
 0x9a2   : > { %v2968_v23 = vmul.f32 0.00390625, %v2967_v44 }
 0x9a4   : > { %v2969_v45 = vadd.f32 1e-05, %v2968_v23 }
 0x9a6   : > { %3646 = vrsqrt.f32 %v2969_v45  ;;  %vm2976_vm11 = vweird.f32 %v2969_v45 }
 0x9ac   : > { %v3647_v40 = vpop.eup %3646 }
 0x9ad   : > { %v2971_v46 = vmul.f32 %v3647_v40, %v2969_v45  ;;  %vm2977_vm10 = vweird.f32 %v3647_v40 }
 0x9ae   : > { %vm2978_vm1 = vmor %vm2976_vm11, %vm2977_vm10 }
 0x9af   : > { %v2972_v6 = vmul.f32 %v3647_v40, %v2971_v46 }
 0x9b1   : > { %v2973_v47 = vmul.f32 0.5, %v2972_v6 }
 0x9b3   : > { %v2974_v10 = vsub.f32 1.5, %v2973_v47 }
 0x9b5   : > { %v2975_v14 = vmul.f32 %v3647_v40, %v2974_v10 }
 0x9b7   : > { %v2979_v48 = vsel %vm2978_vm1, %v3647_v40, %v2975_v14 }
 0x9b8   : > { %v2980_v49 = vmul.f32 %v2979_v48, %v2952_v32  ;;  %v2981_v50 = vmul.f32 %v2979_v48, %v2953_v33  ;;  %v2982_v51 = vmul.f32 %v2979_v48, %v2954_v30 }
 0x9ba   : > { %3019 = vrot.lane.b32.xlu1 %v2981_v50, %s4883_s22  ;;  %3016 = vrot.lane.b32.xlu0 %v2981_v50, %s3749_s9  ;;  %v2983_v52 = vsel %vm1652_vm6, %v2982_v51, 0.0  ;;  %s4886_s9 = smov 38  }
 0x9bb   : > { %2991 = vrot.lane.b32.xlu2 %v2980_v49, %s3751_s29  ;;  %s4887_s29 = smov 20  }
 0x9c2   : > { %3029 = vrot.lane.b32.xlu0 %v2981_v50, %s3743_s8  ;;  %3004 = vrot.lane.b32.xlu1 %v2980_v49, %s3745_s27 }
 0x9c3   : > { %2985 = vrot.lane.b32.xlu2 %v2980_v49, %s4863_s23  ;;  %s4895_s23 = smov 80  }
 0x9ca   : > { %2994 = vrot.lane.b32.xlu1 %v2980_v49, %s3753_s30  ;;  %2988 = vrot.lane.b32.xlu0 %v2980_v49, %s3741_s12  ;;  %s4890_s30 = smov 22   ;;  %s4892_s12 = smov 32  }
 0x9cb   : > { %3035 = vrot.lane.b32.xlu2 %v2983_v52, %s4884_s10 }
 0x9d2   : > { %3010 = vrot.lane.b32.xlu0 %v2981_v50, %s4885_s7 }
 0x9d3   : > { %2997 = vrot.lane.b32.xlu2 %v2980_v49, %s4886_s9 }
 0x9da   : > { %3000 = vrot.lane.b32.xlu0 %v2980_v49, %s4887_s29 }
 0x9e2   : > { %3013 = vrot.lane.b32.xlu0 %v2981_v50, %s4888_s28 }
 0x9ea   : > { %3022 = vrot.lane.b32.xlu0 %v2981_v50, %s4889_s6 }
 0x9f2   : > { %3006 = vrot.lane.b32.xlu0 %v2981_v50, %s3745_s27  ;;  %s4894_s27 = smov 96  }
 0x9fa   : > { %3031 = vrot.lane.b32.xlu0 %v2983_v52, %s3743_s8  ;;  %s4893_s8 = smov 64  }
 0xa02   : > { %3025 = vrot.lane.b32.xlu0 %v2981_v50, %s4890_s30 }
 0xa15   : > { %v2992_v58 = vpop.permute.xlu2 %2991 }
 0xa16   : > { %v3044_v1 = vrot.slane %v2992_v58, 4 }
 0xa1d   : > { %v2986_v61 = vpop.permute.xlu2 %2985 }
 0xa1e   : > { %v3045_v3 = vsel %vm237_vm0, %v3044_v1, %v2986_v61 }
 0xa1f   : > { %v3049_v8 = vperm.slane %v3045_v3, %v3843_v11 }
 0xa21   : > { %v3062_v15 = vrot.slane %v3049_v8, 4 }
 0xa25   : > { %v3036_v4 = vpop.permute.xlu2 %3035 }
 0xa2c   : > { %v3017_v53 = vpop.permute.xlu0 %3016  ;;  %v3020_v60 = vpop.permute.xlu1 %3019 }
 0xa2d   : > { %v3100_v20 = vrot.slane %v3020_v60, 4  ;;  %v3094_v21 = vrot.slane %v3017_v53, 4  ;;  %v2998_v27 = vpop.permute.xlu2 %2997 }
 0xa34   : > { %v3030_v54 = vpop.permute.xlu0 %3029  ;;  %v3005_v63 = vpop.permute.xlu1 %3004 }
 0xa3c   : > { %v2989_v55 = vpop.permute.xlu0 %2988  ;;  %v2995_v9 = vpop.permute.xlu1 %2994 }
 0xa3d   : > { %v3038_v62 = vrot.slane %v2989_v55, 4  ;;  %v3112_v55 = vrot.slane %v3036_v4, 4 }
 0xa3f   : > { %v3039_v0 = vsel %vm237_vm0, %v3038_v62, %v2980_v49 }
 0xa40   : > { %v3043_v5 = vperm.slane %v3039_v0, %v3843_v11 }
 0xa42   : > { %v3064_v12 = vrot.slane %v3043_v5, 4  ;;  %v3063_v22 = vsel %vm237_vm0, %v3062_v15, %v3043_v5 }
 0xa43   : > { %v3069_v30 = vperm.slane %v3063_v22, %v3853_v24 }
 0xa44   : > { %v3011_v56 = vpop.permute.xlu0 %3010  ;;  %v3065_v17 = vsel %vm237_vm0, %v3049_v8, %v3064_v12 }
 0xa45   : > { %v3073_v28 = vperm.slane %v3065_v17, %v3853_v24  ;;  %v3095_v31 = vsel %vm237_vm0, %v3094_v21, %v3011_v56  ;;  %v3088_v42 = vrot.slane %v3069_v30, 4 }
 0xa46   : > { %v3099_v34 = vperm.slane %v3095_v31, %v3843_v11 }
 0xa47   : > { %v3092_v38 = vrot.slane %v3073_v28, 4 }
 0xa48   : > { %v3120_v6 = vrot.slane %v3099_v34, 4 }
 0xa4c   : > { %v3001_v59 = vpop.permute.xlu0 %3000 }
 0xa4d   : > { %v3050_v7 = vrot.slane %v3001_v59, 4 }
 0xa4f   : > { %v3051_v13 = vsel %vm237_vm0, %v3050_v7, %v2995_v9 }
 0xa50   : > { %v3055_v18 = vperm.slane %v3051_v13, %v3843_v11 }
 0xa52   : > { %v3076_v26 = vrot.slane %v3055_v18, 4 }
 0xa54   : > { %v3014_v57 = vpop.permute.xlu0 %3013 }
 0xa55   : > { %v3101_v32 = vsel %vm237_vm0, %v3100_v20, %v3014_v57 }
 0xa56   : > { %v3105_v35 = vperm.slane %v3101_v32, %v3843_v11 }
 0xa58   : > { %v3118_v47 = vrot.slane %v3105_v35, 4  ;;  %v3121_v52 = vsel %vm237_vm0, %v3105_v35, %v3120_v6 }
 0xa59   : > { %v3129_v57 = vperm.slane %v3121_v52, %v3853_v24 }
 0xa5a   : > { %v3119_v59 = vsel %vm237_vm0, %v3118_v47, %v3099_v34 }
 0xa5b   : > { %v3125_v3 = vperm.slane %v3119_v59, %v3853_v24  ;;  %v3148_v8 = vrot.slane %v3129_v57, 4 }
 0xa5c   : > { %v3023_v2 = vpop.permute.xlu0 %3022 }
 0xa5d   : > { %v3144_v15 = vrot.slane %v3125_v3, 4 }
 0xa64   : > { %v3007_v16 = vpop.permute.xlu0 %3006 }
 0xa65   : > { %v3008_v19 = vsel %vm4891_vm12, %v3005_v63, %v3007_v16 }
 0xa66   : > { %v3056_v25 = vrot.slane %v3008_v19, 4 }
 0xa68   : > { %v3057_v33 = vsel %vm237_vm0, %v3056_v25, %v2998_v27 }
 0xa69   : > { %v3061_v29 = vperm.slane %v3057_v33, %v3843_v11 }
 0xa6b   : > { %v3074_v36 = vrot.slane %v3061_v29, 4  ;;  %v3077_v37 = vsel %vm237_vm0, %v3061_v29, %v3076_v26 }
 0xa6c   : > { %v3085_v39 = vperm.slane %v3077_v37, %v3853_v24  ;;  %v3032_v41 = vpop.permute.xlu0 %3031 }
 0xa6d   : > { %v3075_v43 = vsel %vm237_vm0, %v3074_v36, %v3055_v18  ;;  %v3033_v44 = vsel %vm806_vm9, %v3030_v54, %v3032_v41  ;;  %vm4897_vm9 = vcmask 130048  }
 0xa6e   : > { %v3081_v23 = vperm.slane %v3075_v43, %v3853_v24  ;;  %v3090_v45 = vrot.slane %v3085_v39, 4  ;;  %v3093_v40 = vsel %vm237_vm0, %v3085_v39, %v3092_v38  ;;  %v3106_v46 = vrot.slane %v3033_v44, 4  ;;  %vm4898_vm6 = vmmov %vm4897_vm9 }
 0xa6f   : > { %v3162_v10 = vrot.slane %v3093_v40, 4 }
 0xa70   : > { %v3086_v14 = vrot.slane %v3081_v23, 4  ;;  %v3091_v48 = vsel %vm237_vm0, %v3090_v45, %v3073_v28  ;;  %v3107_v49 = vsel %vm237_vm0, %v3106_v46, %v3023_v2  ;;  %v3089_v50 = vsel %vm237_vm0, %v3081_v23, %v3088_v42 }
 0xa71   : > { %v3150_v51 = vrot.slane %v3091_v48, 4  ;;  %v3111_v53 = vperm.slane %v3107_v49, %v3843_v11  ;;  %v3163_v58 = vsel %vm237_vm0, %v3162_v10, %v3089_v50  ;;  %v3164_v20 = vrot.slane %v3089_v50, 4 }
 0xa72   : > { %v3087_v54 = vsel %vm237_vm0, %v3086_v14, %v3069_v30  ;;  %v3169_v1 = vperm.slane %v3163_v58, %v3843_v11 }
 0xa73   : > { %v3151_v56 = vsel %vm237_vm0, %v3150_v51, %v3087_v54  ;;  %v3132_v63 = vrot.slane %v3111_v53, 4  ;;  %v3152_v30 = vrot.slane %v3087_v54, 4  ;;  %v3165_v35 = vsel %vm237_vm0, %v3093_v40, %v3164_v20 }
 0xa74   : > { %v3026_v60 = vpop.permute.xlu0 %3025  ;;  %v3157_v61 = vperm.slane %v3151_v56, %v3843_v11  ;;  %v3173_v44 = vperm.slane %v3165_v35, %v3843_v11  ;;  %v3174_v51 = vrot.slane %v3169_v1, 4 }
 0xa75   : > { %v3113_v62 = vsel %vm237_vm0, %v3112_v55, %v3026_v60  ;;  %v3153_v23 = vsel %vm237_vm0, %v3091_v48, %v3152_v30 }
 0xa76   : > { %v3117_v0 = vperm.slane %v3113_v62, %v3843_v11  ;;  %v3176_v2 = vrot.slane %v3157_v61, 4  ;;  %v3161_v49 = vperm.slane %v3153_v23, %v3843_v11  ;;  %v3186_v50 = vrot.slane %v3173_v44, 4 }
 0xa77   : > { %v3175_v55 = vsel %vm237_vm0, %v3174_v51, %v3157_v61 }
 0xa78   : > { %v3130_v4 = vrot.slane %v3117_v0, 4  ;;  %v3133_v5 = vsel %vm237_vm0, %v3117_v0, %v3132_v63  ;;  %v3177_v7 = vsel %vm237_vm0, %v3169_v1, %v3176_v2  ;;  %v3181_v59 = vperm.slane %v3175_v55, %v3853_v24 }
 0xa79   : > { %v3141_v9 = vperm.slane %v3133_v5, %v3853_v24  ;;  %v4670_v12 = vperm.slane %v3177_v7, %v3853_v24  ;;  %v3188_v60 = vrot.slane %v3161_v49, 4 }
 0xa7a   : > { %v3131_v13 = vsel %vm237_vm0, %v3130_v4, %v3111_v53  ;;  %v3187_v53 = vsel %vm237_vm0, %v3186_v50, %v3161_v49  ;;  %v3198_v62 = vrot.slane %v3181_v59, 4 }
 0xa7b   : > { %v3137_v16 = vperm.slane %v3131_v13, %v3853_v24  ;;  %v3146_v17 = vrot.slane %v3141_v9, 4  ;;  %v3149_v18 = vsel %vm237_vm0, %v3141_v9, %v3148_v8  ;;  %3267 = vrot.lane.b32.xlu0 %v4670_v12, %s4892_s12  ;;  %v3189_v61 = vsel %vm237_vm0, %v3173_v44, %v3188_v60 }
 0xa7c   : > { %v3218_v19 = vrot.slane %v3149_v18, 4  ;;  %v3200_v0 = vrot.slane %v4670_v12, 4  ;;  %v3199_v1 = vsel %vm237_vm0, 0.0, %v3198_v62 }
 0xa7d   : > { %v3142_v21 = vrot.slane %v3137_v16, 4  ;;  %v3145_v22 = vsel %vm237_vm0, %v3137_v16, %v3144_v15  ;;  %v3147_v25 = vsel %vm237_vm0, %v3146_v17, %v3129_v57 }
 0xa7e   : > { %v3206_v27 = vrot.slane %v3147_v25, 4  ;;  %v3220_v28 = vrot.slane %v3145_v22, 4  ;;  %v3219_v31 = vsel %vm237_vm0, %v3218_v19, %v3145_v22  ;;  %v3201_v4 = vsel %vm237_vm0, 0.0, %v3200_v0 }
 0xa7f   : > { %v3143_v32 = vsel %vm237_vm0, %v3142_v21, %v3125_v3  ;;  %v3225_v33 = vperm.slane %v3219_v31, %v3843_v11  ;;  %v3197_v3 = vperm.slane %v3189_v61, %v3853_v24 }
 0xa80   : > { %v3208_v26 = vrot.slane %v3143_v32, 4  ;;  %v3221_v29 = vsel %vm237_vm0, %v3149_v18, %v3220_v28  ;;  %v3207_v34 = vsel %vm237_vm0, %v3206_v27, %v3143_v32 }
 0xa81   : > { %v3229_v36 = vperm.slane %v3221_v29, %v3843_v11  ;;  %v3213_v37 = vperm.slane %v3207_v34, %v3843_v11  ;;  %v3230_v39 = vrot.slane %v3225_v33, 4  ;;  %v3204_v7 = vrot.slane %v3197_v3, 4 }
 0xa82   : > { %v3209_v38 = vsel %vm237_vm0, %v3147_v25, %v3208_v26 }
 0xa83   : > { %v3217_v41 = vperm.slane %v3209_v38, %v3843_v11  ;;  %v3242_v42 = vrot.slane %v3229_v36, 4  ;;  %v3232_v43 = vrot.slane %v3213_v37, 4  ;;  %v3231_v10 = vsel %vm237_vm0, %v3230_v39, %v3213_v37 }
 0xa84   : > { %v3237_v52 = vperm.slane %v3231_v10, %v3853_v24  ;;  %v3193_v11 = vperm.slane %v3187_v53, %v3853_v24  ;;  %v3205_v12 = vsel %vm237_vm0, 0.0, %v3204_v7 }
 0xa85   : > { %v3243_v45 = vsel %vm237_vm0, %v3242_v42, %v3217_v41  ;;  %v3233_v46 = vsel %vm237_vm0, %v3225_v33, %v3232_v43  ;;  %v3244_v40 = vrot.slane %v3217_v41, 4 }
 0xa86   : > { %v3249_v6 = vperm.slane %v3243_v45, %v3853_v24  ;;  %v3241_v47 = vperm.slane %v3233_v46, %v3853_v24  ;;  %v3254_v56 = vrot.slane %v3237_v52, 4  ;;  %v3202_v63 = vrot.slane %v3193_v11, 4  ;;  %v3648_v46 = vld [vmem:[%s3833_s5] sm:$0xff] }
 0xa87   : > { %v3245_v14 = vsel %vm237_vm0, %v3229_v36, %v3244_v40 }
 0xa88   : > { %3303 = vrot.lane.b32.xlu2 %v3249_v6, %s4893_s8  ;;  %3295 = vrot.lane.b32.xlu0 %v3241_v47, %s4892_s12  ;;  %v3253_v48 = vperm.slane %v3245_v14, %v3853_v24  ;;  %v3258_v54 = vrot.slane %v3249_v6, 4  ;;  %v3255_v57 = vsel %vm237_vm0, 0.0, %v3254_v56  ;;  %v3203_v2 = vsel %vm237_vm0, 0.0, %v3202_v63 }
 0xa89   : > { %v3256_v8 = vrot.slane %v3241_v47, 4 }
 0xa8a   : > { %3311 = vrot.lane.b32.xlu1 %v3253_v48, %s4894_s27  ;;  %v3259_v58 = vsel %vm237_vm0, 0.0, %v3258_v54  ;;  %v3260_v5 = vrot.slane %v3253_v48, 4 }
 0xa8b   : > { %v3257_v24 = vsel %vm237_vm0, 0.0, %v3256_v8 }
 0xa8c   : > { %v3261_v9 = vsel %vm237_vm0, 0.0, %v3260_v5  ;;  %vm3319_vm0 = vcmask 261120  }
 0xa90   : > { %3275 = vrot.lane.b32.xlu2 %v3193_v11, %s4893_s8  ;;  %3307 = vrot.lane.b32.xlu0 %v3259_v58, %s4895_s23 }
 0xa92   : > { %3291 = vrot.lane.b32.xlu1 %v3255_v57, %s4842_s14 }
 0xa98   : > { %3263 = vrot.lane.b32.xlu2 %v3199_v1, %s4842_s14  ;;  %3279 = vrot.lane.b32.xlu0 %v3203_v2, %s4895_s23  ;;  %s188_s14 = sand.u32 1, %s3703_s16  }
 0xa99   : > { %s3425_s11 = sshll.u32 %s188_s14, 3  ;;  %s3346_s28 = scalar_lea.sflag [#allocation4], %s188_s14 }
 0xa9a   : > { %3271 = vrot.lane.b32.xlu1 %v3201_v4, %s4896_s13  ;;  %s190_s19 = scalar_lea.vmem [#allocation3], %s3425_s11 }
 0xa9b   : > { %s3359_s9 = sshll.u32 %s190_s19, 4  ;;  %s3360_s9 = int_to_ptr.vmem [resolvable:$true] %s3359_s9 }
 0xaa0   : > { %3315 = vrot.lane.b32.xlu2 %v3261_v9, %s4885_s7  ;;  %3287 = vrot.lane.b32.xlu0 %v3205_v12, %s4885_s7  ;;  %s3357_s7 = scalar_lea.hbm %s4776_s4, %s3562_s20 }
 0xaa1   : > { %s3361_s29 = sshll.u32 %s3357_s7, 4  ;;  %s3362_s29 = int_to_ptr.hbm [resolvable:$true] %s3361_s29 }
 0xaa2   : > { %3299 = vrot.lane.b32.xlu1 %v3257_v24, %s4896_s13  ;;  %s3663_s6 = sshra.s32 %s3362_s29, 4  ;;  %s3664_s6 = int_to_ptr.hbm [resolvable:$true] %s3663_s6 }
 0xaa3   : > { %s3665_s30 = scalar_lea.hbm %s3664_s6, 8  ;;  %p3670_p0 = scmp.lt.s32.totalorder %s3664_s6, %s4776_s4 }
 0xaa4   : > { %p3666_p11 = scmp.ne.s32.totalorder %s3664_s6, %s3665_s30 }
 0xaa6   : > { %p3667_p12 = pnand %p3666_p11, %p3818_p5 }
 0xaa8   : > { %p3668_p13 = pneg %p3667_p12 }
 0xaaa   : > { %3283 = vrot.lane.b32.xlu1 %v3197_v3, %s4894_s27  ;;  %s3669_s27 = scalar_lea.hbm %s4776_s4, 16 }
 0xaab   : > { %p3671_p1 = scmp.lt.s32.totalorder %s3669_s27, %s3665_s30 }
 0xaad   : > { %p3672_p2 = por %p3671_p1, %p3670_p0 }
 0xaaf   : > { %p3673_p3 = pnand %p3672_p2, %p3668_p13 }
 0xae2   : > { %v3304_v15 = vpop.permute.xlu2 %3303 }
 0xaea   : > { %v3276_v19 = vpop.permute.xlu2 %3275 }
 0xaed   : > { %v3268_v13 = vpop.permute.xlu0 %3267 }
 0xaf2   : > { %v3264_v22 = vpop.permute.xlu2 %3263 }
 0xaf3   : > { %v3318_v27 = vsel %vm4898_vm6, %v3181_v59, %v3264_v22 }
 0xaf4   : > { %v3320_v33 = vsel %vm3319_vm0, %v3318_v27, %v3268_v13 }
 0xafa   : > { %v3296_v17 = vpop.permute.xlu0 %3295  ;;  %v3316_v36 = vpop.permute.xlu2 %3315 }
 0xafc   : > { %v3312_v16 = vpop.permute.xlu1 %3311 }
 0xb02   : > { %v3308_v20 = vpop.permute.xlu0 %3307 }
 0xb04   : > { %v3292_v18 = vpop.permute.xlu1 %3291 }
 0xb05   : > { %v3331_v25 = vsel %vm4897_vm9, %v3237_v52, %v3292_v18 }
 0xb06   : > { %v3332_v32 = vsel %vm3319_vm0, %v3331_v25, %v3296_v17 }
 0xb0a   : > { %v3280_v28 = vpop.permute.xlu0 %3279 }
 0xb0c   : > { %v3272_v21 = vpop.permute.xlu1 %3271 }
 0xb0d   : > { %v3322_v26 = vsel %vm3321_vm14, %v3320_v33, %v3272_v21 }
 0xb0e   : > { %v3324_v37 = vsel %vm3323_vm7, %v3322_v26, %v3276_v19 }
 0xb0f   : > { %v3326_v41 = vsel %vm3325_vm15, %v3324_v37, %v3280_v28 }
 0xb12   : > { %v3288_v42 = vpop.permute.xlu0 %3287 }
 0xb14   : > { %v3300_v31 = vpop.permute.xlu1 %3299 }
 0xb15   : > { %v3333_v30 = vsel %vm3321_vm14, %v3332_v32, %v3300_v31 }
 0xb16   : > { %v3334_v29 = vsel %vm3323_vm7, %v3333_v30, %v3304_v15 }
 0xb17   : > { %v3335_v34 = vsel %vm3325_vm15, %v3334_v29, %v3308_v20 }
 0xb18   : > { %v3336_v35 = vsel %vm3327_vm2, %v3335_v34, %v3312_v16 }
 0xb19   : > { %v3337_v38 = vsel %vm3329_vm3, %v3336_v35, %v3316_v36 }
 0xb1a   : > { %v3340_v44 = vrot.slane %v3337_v38, 4 }
 0xb1c   : > { %v3284_v39 = vpop.permute.xlu1 %3283 }
 0xb1d   : > { %v3328_v43 = vsel %vm3327_vm2, %v3326_v41, %v3284_v39 }
 0xb1e   : > { %v3330_v23 = vsel %vm3329_vm3, %v3328_v43, %v3288_v42 }
 0xb1f   : > { %v3341_v45 = vsel %vm754_vm4, %v3330_v23, %v3340_v44 }
 0xb20   : > { %v3343_v40 = vadd.f32 %v3648_v46, %v3341_v45 }
 0xb22   : > { %3344 = vst [vmem:[%s190_s19] sm:$0xff] %v3343_v40 }
 0xb23   : > { %3676 = shalt.err (!%p3673_p3)
}
 0xb24   : > { %3563 = dma.vmem_to_hbm [thread:$0]  (%p3818_p5), %s3360_s9, 128, %s3362_s29, %s3346_s28  }
 0xb25 PF: > { %p3569_p4 = scmp.ge.s32.totalorder %s3711_s18, 2  ;;  %s3373_s5 = sand.u32 1, %s3699_s15  }
 0xb26   : > { %s3374_s14 = scalar_lea.sflag [#allocation4], %s3373_s5 }
 0xb27   : > { %p3566_p7 = pnand %p3569_p4, %p3822_p6 }
 0xb29   : > { %p3567_p8 = pneg %p3566_p7 }
 0xb2b   : > { %3694 = dma.done.wait (%p3567_p8), %s3374_s14, 128  }
 0xb2c   : > { %3696 = vsyncadd (%p3567_p8), %s3374_s14, 4294967168  ;;  %p14_p9 = scmp.ge.s32.totalorder %s3805_s21, 4   ;;  %s4899_s15 = smov %s3703_s16 }
 0xb2d   : > { %s4900_s16 = smov %s3707_s17  ;;  %s4901_s17 = smov %s3816_s24 }
 0xb2e   : > { %s4902_s18 = smov %s3805_s21  ;;  %16 = sbr.rel (!%p14_p9) target bundleno = 3 (0x3), region = 126 }
 0xb33   :  { %3380 = vsyncpa [#allocation4], 1 }
 0xb34   :  { %3382 = vsyncpa [#allocation4 + $0x1], 1 }

</bundles_post_ra>
